<compile_context>
chip_gen: v7x
topology: tpu7x:2x2x1
jax: 0.10.0
libtpu: 0.0.40
codegen_flags: <defaults>
</compile_context>

<pallas_src>
import functools

import jax
import jax.numpy as jnp
from jax import lax
from jax.experimental import pallas as pl
from jax.experimental.pallas import tpu as pltpu

# Working set at the default tiles is ~15 MiB; 48 MiB stays well under v7x's
# 64 MiB physical VMEM while giving v5e/v6e headroom for bigger tiles.
_VMEM_LIMIT = 48 * 1024 * 1024


# ----------------------------------------------------------------------------
# Kernel A: conv3x3(s2)+bias, maxpool2x2(+indices), 1x1 conv2, concat, BN pass1
# ----------------------------------------------------------------------------
def _fused_a_kernel(W_in, OW, t, Cin, Ca, Cn, PW, do_conv2, *refs):
    if do_conv2:
        (s2d_ref, halo_ref, w_ref, bias_ref, w2_ref, out_ref, stats_ref) = refs
    else:
        (s2d_ref, halo_ref, w_ref, bias_ref, out_ref, stats_ref) = refs
        w2_ref = None

    j = pl.program_id(1)
    C4 = 4 * Cin
    TM = t * OW

    # Current space-to-depth tile; lane layout is (dh, dw, c) per output pixel.
    S = s2d_ref[...]                                          # (t, OW, 4*Cin)

    # Block-row above each output row.  Row 0 comes from the halo stream (last
    # block-row of the previous tile; zero-filled by the wrapper at the image
    # top == the conv's implicit top padding row).
    if t > 1:
        P = jnp.concatenate([halo_ref[...], S[:t - 1]], axis=0)
    else:
        P = halo_ref[...]

    # Block-column to the left (zero fill at ow == 0 == left padding column).
    zcol = jnp.zeros((t, 1, C4), jnp.float32)
    if OW > 1:
        LS = jnp.concatenate([zcol, S[:, :OW - 1, :]], axis=1)
        LP = jnp.concatenate([zcol, P[:, :OW - 1, :]], axis=1)
    else:
        LS = zcol
        LP = zcol

    Sf = S.reshape(TM, C4)

    # 3x3 / stride-2 conv == 4 accumulated MXU matmuls.  Weight columns are
    # pre-placed so the conv result lands directly in lanes [0:Ca).
    acc = jnp.dot(Sf, w_ref[0], preferred_element_type=jnp.float32)
    acc += jnp.dot(P.reshape(TM, C4), w_ref[1], preferred_element_type=jnp.float32)
    acc += jnp.dot(LS.reshape(TM, C4), w_ref[2], preferred_element_type=jnp.float32)
    acc += jnp.dot(LP.reshape(TM, C4), w_ref[3], preferred_element_type=jnp.float32)
    acc += bias_ref[...]            # conv bias at [0:Ca), conv2 bias at its lanes

    # 2x2 / stride-2 max pool + argmax offsets straight from the s2d lanes.
    v00 = Sf[:, 0 * Cin:1 * Cin]
    v01 = Sf[:, 1 * Cin:2 * Cin]
    v10 = Sf[:, 2 * Cin:3 * Cin]
    v11 = Sf[:, 3 * Cin:4 * Cin]
    m0 = jnp.maximum(v00, v01)
    m1 = jnp.maximum(v10, v11)
    bmax = jnp.maximum(m0, m1)                                # (TM, Cin)
    o0 = jnp.where(v01 > v00, 1, 0).astype(jnp.int32)
    o1 = jnp.where(v11 > v10, W_in + 1, W_in).astype(jnp.int32)
    off = jnp.where(m1 > m0, o1, o0)                          # (TM, Cin)

    # Flat-index base ramp: only the Cin surviving lanes (cheap on v5e's VPU).
    oh = j * t + lax.broadcasted_iota(jnp.int32, (t, OW, Cin), 0)
    ow = lax.broadcasted_iota(jnp.int32, (t, OW, Cin), 1)
    idx = ((2 * oh) * W_in + 2 * ow).reshape(TM, Cin) + off   # (TM, Cin) int32

    # Fused 1x1 conv (conv2): weight columns already sit at lanes [Cn+Cin:).
    if do_conv2:
        acc += jnp.dot(bmax, w2_ref[...], preferred_element_type=jnp.float32)

    # out1 = [conv | pool] occupies lanes [0:Cn); lanes [Cn:Cn+Cin) stay 0.
    pieces = []
    if Ca > 0:
        pieces.append(jnp.zeros((TM, Ca), jnp.float32))
    pieces.append(bmax)
    if PW - Cn > 0:
        pieces.append(jnp.zeros((TM, PW - Cn), jnp.float32))
    out1_full = acc + (pieces[0] if len(pieces) == 1
                       else jnp.concatenate(pieces, axis=1))

    # BN pass 1: per-(n, j) partial sums; reduced in the wrapper.  No revisited
    # output block -> both grid axes stay "parallel" (v7x megacore).
    s1 = jnp.sum(out1_full, axis=0, keepdims=True)
    s2 = jnp.sum(out1_full * out1_full, axis=0, keepdims=True)
    stats_ref[...] = jnp.concatenate([s1, s2], axis=0).reshape(1, 2, PW)

    # Splice the int32 pool indices bit-exactly into lanes [Cn:Cn+Cin) of the
    # single packed, lane-dense output tile.
    ipieces = [jnp.zeros((TM, Cn), jnp.int32), idx]
    if PW - Cn - Cin > 0:
        ipieces.append(jnp.zeros((TM, PW - Cn - Cin), jnp.int32))
    idx_bits = pltpu.bitcast(jnp.concatenate(ipieces, axis=1), jnp.float32)
    lane = lax.broadcasted_iota(jnp.int32, (TM, PW), 1)
    is_idx = (lane >= Cn) & (lane < Cn + Cin)
    out_ref[...] = jnp.where(is_idx, idx_bits, out1_full)


# ----------------------------------------------------------------------------
# Kernel B: BatchNorm pass 2 (precomputed affine) + ReLU
# ----------------------------------------------------------------------------
def _bn_relu_kernel(x_ref, scale_ref, shift_ref, o_ref):
    o_ref[...] = jnp.maximum(x_ref[...] * scale_ref[...] + shift_ref[...], 0.0)


# ----------------------------------------------------------------------------
# Wrapper
# ----------------------------------------------------------------------------
def _row_tile(OH, OW, target_rows=1024):
    # Largest divisor t of OH with t*OW <= target_rows.
    # TODO(synk): ragged last tile (pl.cdiv grid + masking) for awkward OH.
    t = max(1, min(OH, max(1, target_rows // OW)))
    while OH % t:
        t -= 1
    return t


def _flat_tile(R, OW, target_rows=4096):
    # Largest multiple-of-8 divisor of R that is <= target_rows.
    if R <= target_rows:
        return R
    for d in range(target_rows - target_rows % 8, 7, -8):
        if R % d == 0:
            return d
    return OW


@jax.jit
def downsampler_block(x_nchw, params):
    N, Cin, H, W = x_nchw.shape
    Ca = params["conv_w"].shape[0]          # noutput - ninput
    Cn = Ca + Cin                           # noutput
    assert H % 2 == 0 and W % 16 == 0, "requires even H and W multiple of 16"
    OH, OW = H // 2, W // 2
    R = N * OH * OW
    C4 = 4 * Cin
    do_conv2 = (Cin == 16)
    C2 = params["conv2_w"].shape[0] if do_conv2 else 0

    # Packed-lane layout of kernel A's single output buffer.
    used = Cn + Cin + C2
    PW = 128 * ((used + 127) // 128)        # packed width (128 in common cases)
    BW = 128 * ((Cn + 127) // 128)          # lanes kernel B has to touch

    # --- glue: space-to-depth view (one XLA transpose; the only pre-pass) ----
    # s2d[n*OH + oh, ow, (2*dh+dw)*Cin + c] = x[n, c, 2*oh+dh, 2*ow+dw]
    s2d = jnp.transpose(
        x_nchw.reshape(N, Cin, OH, 2, OW, 2), (0, 2, 4, 3, 5, 1)
    ).reshape(N * OH, OW, C4).astype(jnp.float32)

    t = _row_tile(OH, OW)
    TM = t * OW
    n_rt = OH // t
    grid = (N, n_rt)

    # Halo stream: last block-row of the previous tile; zeros for the first
    # tile of every image (== the conv's top padding row).  Tiny array.
    if n_rt > 1:
        tile_last = s2d.reshape(N, n_rt, t, OW, C4)[:, :, t - 1]
        halo = jnp.concatenate(
            [jnp.zeros((N, 1, OW, C4), jnp.float32), tile_last[:, :-1]], axis=1)
    else:
        halo = jnp.zeros((N, 1, OW, C4), jnp.float32)
    halo = halo.reshape(N * n_rt, OW, C4)

    # --- glue: per-tap weights, lane-placed so the MXU writes final lanes ----
    wk = jnp.transpose(params["conv_w"], (2, 3, 1, 0))        # (3, 3, Cin, Ca)

    def lane_block(rows_by_tap):
        w = jnp.zeros((C4, PW), jnp.float32)
        for tap, wt in rows_by_tap.items():
            w = w.at[tap * Cin:(tap + 1) * Cin, :Ca].set(wt)
        return w

    # tap index = 2*dh + dw of the space-to-depth lane group.
    w_main = lane_block({0: wk[1, 1], 1: wk[1, 2], 2: wk[2, 1], 3: wk[2, 2]})
    w_prev = lane_block({2: wk[0, 1], 3: wk[0, 2]})
    w_left = lane_block({1: wk[1, 0], 3: wk[2, 0]})
    w_pleft = lane_block({3: wk[0, 0]})
    w_stack = jnp.stack([w_main, w_prev, w_left, w_pleft])    # (4, 4*Cin, PW)

    bias = jnp.zeros((1, PW), jnp.float32).at[0, :Ca].set(params["conv_b"])
    if do_conv2:
        bias = bias.at[0, Cn + Cin:Cn + Cin + C2].set(params["conv2_b"])
        w2_2d = jnp.transpose(params["conv2_w"], (2, 3, 1, 0)).reshape(Cin, C2)
        w2 = jnp.zeros((Cin, PW), jnp.float32).at[
            :, Cn + Cin:Cn + Cin + C2].set(w2_2d)

    row_map = lambda n, j: (n * n_rt + j, 0, 0)
    out_map = lambda n, j: (n * n_rt + j, 0)
    const2 = lambda n, j: (0, 0)
    const3 = lambda n, j: (0, 0, 0)

    in_specs = [pl.BlockSpec((t, OW, C4), row_map),
                pl.BlockSpec((1, OW, C4), row_map),
                pl.BlockSpec((4, C4, PW), const3),
                pl.BlockSpec((1, PW), const2)]
    inputs = [s2d, halo, w_stack, bias]
    if do_conv2:
        in_specs.append(pl.BlockSpec((Cin, PW), const2))
        inputs.append(w2)

    out_shapes = (jax.ShapeDtypeStruct((R, PW), jnp.float32),       # packed
                  jax.ShapeDtypeStruct((N * n_rt, 2, PW), jnp.float32))  # stats
    out_specs = (pl.BlockSpec((TM, PW), out_map),
                 pl.BlockSpec((1, 2, PW), row_map))

    kernel_a = functools.partial(_fused_a_kernel, W, OW, t, Cin, Ca, Cn, PW,
                                 do_conv2)
    packed, stats = pl.pallas_call(
        kernel_a,
        grid=grid,
        in_specs=in_specs,
        out_specs=out_specs,
        out_shape=out_shapes,
        compiler_params=pltpu.CompilerParams(
            dimension_semantics=("parallel", "parallel"),
            vmem_limit_bytes=_VMEM_LIMIT),
    )(*inputs)

    # --- BatchNorm statistics (training mode, biased variance) ---------------
    total = jnp.sum(stats[:, 0, :BW], axis=0)
    total_sq = jnp.sum(stats[:, 1, :BW], axis=0)
    mean = total / R
    var = jnp.maximum(total_sq / R - mean * mean, 0.0)
    inv = lax.rsqrt(var + 1e-3)
    gamma = jnp.zeros((BW,), jnp.float32).at[:Cn].set(params["bn_gamma"])
    beta = jnp.zeros((BW,), jnp.float32).at[:Cn].set(params["bn_beta"])
    scale = (gamma * inv).reshape(1, BW)
    shift = (beta - mean * gamma * inv).reshape(1, BW)

    # --- BatchNorm pass 2 + ReLU: its own larger lane-dense row tile ---------
    TB = _flat_tile(R, OW)
    relu_pad = pl.pallas_call(
        _bn_relu_kernel,
        grid=(R // TB,),
        in_specs=[pl.BlockSpec((TB, BW), lambda i: (i, 0)),
                  pl.BlockSpec((1, BW), lambda i: (0, 0)),
                  pl.BlockSpec((1, BW), lambda i: (0, 0))],
        out_specs=pl.BlockSpec((TB, BW), lambda i: (i, 0)),
        out_shape=jax.ShapeDtypeStruct((R, BW), jnp.float32),
        compiler_params=pltpu.CompilerParams(
            dimension_semantics=("parallel",),
            vmem_limit_bytes=_VMEM_LIMIT),
    )(packed, scale, shift)

    # --- glue: unpack lanes (slice BEFORE transposing), restore NCHW ---------
    def to_nchw(flat2d):
        c = flat2d.shape[-1]
        return jnp.transpose(flat2d.reshape(N, OH, OW, c), (0, 3, 1, 2))

    relu_out = to_nchw(relu_pad[:, :Cn])
    output1 = to_nchw(packed[:, :Cn])
    b = to_nchw(packed[:, Ca:Cn])
    idx = to_nchw(lax.bitcast_convert_type(packed[:, Cn:Cn + Cin], jnp.int32))
    b_c = to_nchw(packed[:, Cn + Cin:Cn + Cin + C2]) if do_conv2 else b
    return relu_out, idx, b, b_c, output1


# ----------------------------------------------------------------------------
# Deterministic parameter init (synthetic; shapes from the module __init__)
# ----------------------------------------------------------------------------
def init_params(key, ninput, noutput):
    k1, k2, k3, k4 = jax.random.split(key, 4)
    return {
        "conv_w": 0.1 * jax.random.normal(k1, (noutput - ninput, ninput, 3, 3),
                                          jnp.float32),
        "conv_b": 0.1 * jax.random.normal(k2, (noutput - ninput,), jnp.float32),
        "conv2_w": 0.1 * jax.random.normal(k3, (64, 16, 1, 1), jnp.float32),
        "conv2_b": 0.1 * jax.random.normal(k4, (64,), jnp.float32),
        "bn_gamma": jnp.ones((noutput,), jnp.float32),
        "bn_beta": jnp.zeros((noutput,), jnp.float32),
    }


# ----------------------------------------------------------------------------
# Pure-JAX reference (self-contained correctness check)
# ----------------------------------------------------------------------------
def reference(x, p):
    dn = ("NCHW", "OIHW", "NCHW")
    a = lax.conv_general_dilated(x, p["conv_w"], (2, 2), ((1, 1), (1, 1)),
                                 dimension_numbers=dn,
                                 precision=lax.Precision.HIGHEST)
    a = a + p["conv_b"][None, :, None, None]
    N, C, H, W = x.shape
    OH, OW = H // 2, W // 2
    xr = x.reshape(N, C, OH, 2, OW, 2).transpose(0, 1, 2, 4, 3, 5)
    xr = xr.reshape(N, C, OH, OW, 4)
    b = xr.max(-1)
    arg = jnp.argmax(xr, -1)
    dh, dw = arg // 2, arg % 2
    oh = jnp.arange(OH)[:, None]
    ow = jnp.arange(OW)[None, :]
    idx = ((2 * oh + dh) * W + (2 * ow + dw)).astype(jnp.int32)
    out1 = jnp.concatenate([a, b], axis=1)
    if b.shape[1] == 16:
        bc = lax.conv_general_dilated(b, p["conv2_w"], (1, 1), ((0, 0), (0, 0)),
                                      dimension_numbers=dn,
                                      precision=lax.Precision.HIGHEST)
        bc = bc + p["conv2_b"][None, :, None, None]
    else:
        bc = b
    mean = out1.mean((0, 2, 3), keepdims=True)
    var = ((out1 - mean) ** 2).mean((0, 2, 3), keepdims=True)
    y = (out1 - mean) / jnp.sqrt(var + 1e-3)
    y = y * p["bn_gamma"][None, :, None, None] + p["bn_beta"][None, :, None, None]
    return jnp.maximum(y, 0.0), idx, b, bc, out1


if __name__ == "__main__":
    ninput, noutput = 16, 24          # ninput=16 exercises the conv2 branch
    N, H, W = 2, 16, 16

    key = jax.random.PRNGKey(0)
    kx, kp = jax.random.split(key)
    x = jax.random.normal(kx, (N, ninput, H, W), jnp.float32)   # NCHW like PyTorch
    params = init_params(kp, ninput, noutput)

    outs = downsampler_block(x, params)
    outs = jax.block_until_ready(outs)

    refs = reference(x, params)
    names = ["relu(bn(output1))", "max_indices", "b", "b_c", "output1"]
    for name, got, want in zip(names, outs, refs):
        assert got.shape == want.shape, (name, got.shape, want.shape)
        if got.dtype in (jnp.int32, jnp.int64):
            assert bool(jnp.all(got == want)), f"mismatch in {name}"
        else:
            assert bool(jnp.allclose(got, want, rtol=1e-3, atol=1e-3)), \
                f"mismatch in {name}"

    print("KERNEL_OK")
</pallas_src>

<mosaic_0001>
module attributes {stable_mosaic.version = 11 : i64} {
  func.func @_bn_relu_kernel(%arg0: i32, %arg1: memref<128x128xf32, #tpu.memory_space<vmem>>, %arg2: memref<1x128xf32, #tpu.memory_space<vmem>>, %arg3: memref<1x128xf32, #tpu.memory_space<vmem>>, %arg4: memref<128x128xf32, #tpu.memory_space<vmem>>) attributes {dimension_semantics = [#tpu.dimension_semantics<parallel>], iteration_bounds = array<i64: 1>, scalar_prefetch = 0 : i64, scratch_operands = 0 : i64, tpu.core_type = #tpu.core_type<tc>, window_params = [{transform_indices = @transform_0, window_bounds = array<i64: 128, 128>}, {pipeline_mode = #tpu.pipeline_mode<synchronous>, transform_indices = @transform_1, window_bounds = array<i64: 1, 128>}, {pipeline_mode = #tpu.pipeline_mode<synchronous>, transform_indices = @transform_2, window_bounds = array<i64: 1, 128>}, {transform_indices = @transform_3, window_bounds = array<i64: 128, 128>}]} {
    %c0 = arith.constant 0 : index
    %c0_0 = arith.constant 0 : index
    %0 = vector.load %arg1[%c0, %c0_0] : memref<128x128xf32, #tpu.memory_space<vmem>>, vector<128x128xf32>
    %c0_1 = arith.constant 0 : index
    %c0_2 = arith.constant 0 : index
    %1 = vector.load %arg2[%c0_1, %c0_2] : memref<1x128xf32, #tpu.memory_space<vmem>>, vector<1x128xf32>
    %2 = vector.broadcast %1 : vector<1x128xf32> to vector<128x128xf32>
    %3 = arith.mulf %0, %2 : vector<128x128xf32>
    %c0_3 = arith.constant 0 : index
    %c0_4 = arith.constant 0 : index
    %4 = vector.load %arg3[%c0_3, %c0_4] : memref<1x128xf32, #tpu.memory_space<vmem>>, vector<1x128xf32>
    %5 = vector.broadcast %4 : vector<1x128xf32> to vector<128x128xf32>
    %6 = arith.addf %3, %5 : vector<128x128xf32>
    %cst = arith.constant 0.000000e+00 : f32
    %7 = vector.broadcast %cst : f32 to vector<128x128xf32>
    %8 = arith.maximumf %6, %7 : vector<128x128xf32>
    %c0_5 = arith.constant 0 : index
    %c0_6 = arith.constant 0 : index
    %9 = vector.load %arg4[%c0_5, %c0_6] : memref<128x128xf32, #tpu.memory_space<vmem>>, vector<128x128xf32>
    tpu.vector_store %arg4[%c0_5, %c0_6], %8 {strides = array<i32>} : memref<128x128xf32, #tpu.memory_space<vmem>>, vector<128x128xf32>,
    return
  }
  func.func @transform_0(%arg0: i32) -> (i32, i32) {
    %c0_i32 = arith.constant 0 : i32
    %c0_i32_0 = arith.constant 0 : i32
    return %arg0, %c0_i32 : i32, i32
  }
  func.func @transform_1(%arg0: i32) -> (i32, i32) {
    %c0_i32 = arith.constant 0 : i32
    %c0_i32_0 = arith.constant 0 : i32
    %c0_i32_1 = arith.constant 0 : i32
    return %c0_i32, %c0_i32_0 : i32, i32
  }
  func.func @transform_2(%arg0: i32) -> (i32, i32) {
    %c0_i32 = arith.constant 0 : i32
    %c0_i32_0 = arith.constant 0 : i32
    %c0_i32_1 = arith.constant 0 : i32
    return %c0_i32, %c0_i32_0 : i32, i32
  }
  func.func @transform_3(%arg0: i32) -> (i32, i32) {
    %c0_i32 = arith.constant 0 : i32
    %c0_i32_0 = arith.constant 0 : i32
    return %arg0, %c0_i32 : i32, i32
  }
}

module attributes {stable_mosaic.version = 11 : i64} {
  func.func @_fused_a_kernel(%arg0: i32, %arg1: i32, %arg2: memref<8x8x64xf32, #tpu.memory_space<vmem>>, %arg3: memref<1x8x64xf32, #tpu.memory_space<vmem>>, %arg4: memref<4x64x128xf32, #tpu.memory_space<vmem>>, %arg5: memref<1x128xf32, #tpu.memory_space<vmem>>, %arg6: memref<16x128xf32, #tpu.memory_space<vmem>>, %arg7: memref<64x128xf32, #tpu.memory_space<vmem>>, %arg8: memref<1x2x128xf32, #tpu.memory_space<vmem>>) attributes {dimension_semantics = [#tpu.dimension_semantics<parallel>, #tpu.dimension_semantics<parallel>], iteration_bounds = array<i64: 2, 1>, scalar_prefetch = 0 : i64, scratch_operands = 0 : i64, tpu.core_type = #tpu.core_type<tc>, window_params = [{transform_indices = @transform_0, window_bounds = array<i64: 8, 8, 64>}, {transform_indices = @transform_1, window_bounds = array<i64: 1, 8, 64>}, {pipeline_mode = #tpu.pipeline_mode<synchronous>, transform_indices = @transform_2, window_bounds = array<i64: 4, 64, 128>}, {pipeline_mode = #tpu.pipeline_mode<synchronous>, transform_indices = @transform_3, window_bounds = array<i64: 1, 128>}, {pipeline_mode = #tpu.pipeline_mode<synchronous>, transform_indices = @transform_4, window_bounds = array<i64: 16, 128>}, {transform_indices = @transform_5, window_bounds = array<i64: 64, 128>}, {transform_indices = @transform_6, window_bounds = array<i64: 1, 2, 128>}]} {
    %c0 = arith.constant 0 : index
    %c0_0 = arith.constant 0 : index
    %c0_1 = arith.constant 0 : index
    %0 = vector.load %arg2[%c0, %c0_0, %c0_1] : memref<8x8x64xf32, #tpu.memory_space<vmem>>, vector<8x8x64xf32>
    %c0_2 = arith.constant 0 : index
    %c0_3 = arith.constant 0 : index
    %c0_4 = arith.constant 0 : index
    %1 = vector.load %arg3[%c0_2, %c0_3, %c0_4] : memref<1x8x64xf32, #tpu.memory_space<vmem>>, vector<1x8x64xf32>
    %2 = vector.extract_strided_slice %0 {offsets = [0, 0, 0], sizes = [7, 8, 64], strides = [1, 1, 1]} : vector<8x8x64xf32> to vector<7x8x64xf32>
    %3 = tpu.concatenate %1, %2 in 0 : vector<1x8x64xf32>, vector<7x8x64xf32> -> vector<8x8x64xf32>
    %cst = arith.constant 0.000000e+00 : f32
    %4 = vector.broadcast %cst : f32 to vector<8x1x64xf32>
    %5 = vector.extract_strided_slice %0 {offsets = [0, 0, 0], sizes = [8, 7, 64], strides = [1, 1, 1]} : vector<8x8x64xf32> to vector<8x7x64xf32>
    %6 = tpu.concatenate %4, %5 in 1 : vector<8x1x64xf32>, vector<8x7x64xf32> -> vector<8x8x64xf32>
    %7 = vector.extract_strided_slice %3 {offsets = [0, 0, 0], sizes = [8, 7, 64], strides = [1, 1, 1]} : vector<8x8x64xf32> to vector<8x7x64xf32>
    %8 = tpu.concatenate %4, %7 in 1 : vector<8x1x64xf32>, vector<8x7x64xf32> -> vector<8x8x64xf32>
    %9 = vector.shape_cast %0 : vector<8x8x64xf32> to vector<64x64xf32>
    %c0_5 = arith.constant 0 : index
    %c0_6 = arith.constant 0 : index
    %c0_7 = arith.constant 0 : index
    %10 = vector.load %arg4[%c0_5, %c0_6, %c0_7] : memref<4x64x128xf32, #tpu.memory_space<vmem>>, vector<1x64x128xf32>
    %11 = vector.shape_cast %10 : vector<1x64x128xf32> to vector<64x128xf32>
    %cst_8 = arith.constant dense<0.000000e+00> : vector<64x128xf32>
    %12 = tpu.matmul %9, %11, %cst_8 {dimension_numbers = #tpu.dot_dimension_numbers<[1], [0], [0], [1], [0, 0, 1, 1], [], []>} : vector<64x64xf32>, vector<64x128xf32>, vector<64x128xf32> -> vector<64x128xf32>
    %13 = vector.shape_cast %3 : vector<8x8x64xf32> to vector<64x64xf32>
    %c1 = arith.constant 1 : index
    %c0_9 = arith.constant 0 : index
    %c0_10 = arith.constant 0 : index
    %14 = vector.load %arg4[%c1, %c0_9, %c0_10] : memref<4x64x128xf32, #tpu.memory_space<vmem>>, vector<1x64x128xf32>
    %15 = vector.shape_cast %14 : vector<1x64x128xf32> to vector<64x128xf32>
    %cst_11 = arith.constant dense<0.000000e+00> : vector<64x128xf32>
    %16 = tpu.matmul %13, %15, %cst_11 {dimension_numbers = #tpu.dot_dimension_numbers<[1], [0], [0], [1], [0, 0, 1, 1], [], []>} : vector<64x64xf32>, vector<64x128xf32>, vector<64x128xf32> -> vector<64x128xf32>
    %17 = arith.addf %12, %16 : vector<64x128xf32>
    %18 = vector.shape_cast %6 : vector<8x8x64xf32> to vector<64x64xf32>
    %c2 = arith.constant 2 : index
    %c0_12 = arith.constant 0 : index
    %c0_13 = arith.constant 0 : index
    %19 = vector.load %arg4[%c2, %c0_12, %c0_13] : memref<4x64x128xf32, #tpu.memory_space<vmem>>, vector<1x64x128xf32>
    %20 = vector.shape_cast %19 : vector<1x64x128xf32> to vector<64x128xf32>
    %cst_14 = arith.constant dense<0.000000e+00> : vector<64x128xf32>
    %21 = tpu.matmul %18, %20, %cst_14 {dimension_numbers = #tpu.dot_dimension_numbers<[1], [0], [0], [1], [0, 0, 1, 1], [], []>} : vector<64x64xf32>, vector<64x128xf32>, vector<64x128xf32> -> vector<64x128xf32>
    %22 = arith.addf %17, %21 : vector<64x128xf32>
    %23 = vector.shape_cast %8 : vector<8x8x64xf32> to vector<64x64xf32>
    %c3 = arith.constant 3 : index
    %c0_15 = arith.constant 0 : index
    %c0_16 = arith.constant 0 : index
    %24 = vector.load %arg4[%c3, %c0_15, %c0_16] : memref<4x64x128xf32, #tpu.memory_space<vmem>>, vector<1x64x128xf32>
    %25 = vector.shape_cast %24 : vector<1x64x128xf32> to vector<64x128xf32>
    %cst_17 = arith.constant dense<0.000000e+00> : vector<64x128xf32>
    %26 = tpu.matmul %23, %25, %cst_17 {dimension_numbers = #tpu.dot_dimension_numbers<[1], [0], [0], [1], [0, 0, 1, 1], [], []>} : vector<64x64xf32>, vector<64x128xf32>, vector<64x128xf32> -> vector<64x128xf32>
    %27 = arith.addf %22, %26 : vector<64x128xf32>
    %c0_18 = arith.constant 0 : index
    %c0_19 = arith.constant 0 : index
    %28 = vector.load %arg5[%c0_18, %c0_19] : memref<1x128xf32, #tpu.memory_space<vmem>>, vector<1x128xf32>
    %29 = vector.broadcast %28 : vector<1x128xf32> to vector<64x128xf32>
    %30 = arith.addf %27, %29 : vector<64x128xf32>
    %31 = vector.extract_strided_slice %9 {offsets = [0, 0], sizes = [64, 16], strides = [1, 1]} : vector<64x64xf32> to vector<64x16xf32>
    %32 = vector.extract_strided_slice %9 {offsets = [0, 16], sizes = [64, 16], strides = [1, 1]} : vector<64x64xf32> to vector<64x16xf32>
    %33 = vector.extract_strided_slice %9 {offsets = [0, 32], sizes = [64, 16], strides = [1, 1]} : vector<64x64xf32> to vector<64x16xf32>
    %34 = vector.extract_strided_slice %9 {offsets = [0, 48], sizes = [64, 16], strides = [1, 1]} : vector<64x64xf32> to vector<64x16xf32>
    %35 = arith.maximumf %31, %32 : vector<64x16xf32>
    %36 = arith.maximumf %33, %34 : vector<64x16xf32>
    %37 = arith.maximumf %35, %36 : vector<64x16xf32>
    %38 = arith.cmpf ogt, %32, %31 : vector<64x16xf32>
    %c1_i32 = arith.constant 1 : i32
    %c0_i32 = arith.constant 0 : i32
    %39 = vector.broadcast %c1_i32 : i32 to vector<64x16xi32>
    %40 = vector.broadcast %c0_i32 : i32 to vector<64x16xi32>
    %41 = arith.select %38, %39, %40 : vector<64x16xi1>, vector<64x16xi32>
    %42 = arith.cmpf ogt, %34, %33 : vector<64x16xf32>
    %c17_i32 = arith.constant 17 : i32
    %c16_i32 = arith.constant 16 : i32
    %43 = vector.broadcast %c17_i32 : i32 to vector<64x16xi32>
    %44 = vector.broadcast %c16_i32 : i32 to vector<64x16xi32>
    %45 = arith.select %42, %43, %44 : vector<64x16xi1>, vector<64x16xi32>
    %46 = arith.cmpf ogt, %36, %35 : vector<64x16xf32>
    %47 = arith.select %46, %45, %41 : vector<64x16xi1>, vector<64x16xi32>
    %c8_i32 = arith.constant 8 : i32
    %48 = arith.muli %arg1, %c8_i32 : i32
    %49 = tpu.iota {dimensions = array<i32: 0>} : vector<8x8x16xi32>
    %50 = vector.broadcast %48 : i32 to vector<8x8x16xi32>
    %51 = arith.addi %50, %49 : vector<8x8x16xi32>
    %52 = tpu.iota {dimensions = array<i32: 1>} : vector<8x8x16xi32>
    %c2_i32 = arith.constant 2 : i32
    %53 = vector.broadcast %c2_i32 : i32 to vector<8x8x16xi32>
    %54 = arith.muli %53, %51 : vector<8x8x16xi32>
    %c16_i32_20 = arith.constant 16 : i32
    %55 = vector.broadcast %c16_i32_20 : i32 to vector<8x8x16xi32>
    %56 = arith.muli %54, %55 : vector<8x8x16xi32>
    %c2_i32_21 = arith.constant 2 : i32
    %57 = vector.broadcast %c2_i32_21 : i32 to vector<8x8x16xi32>
    %58 = arith.muli %57, %52 : vector<8x8x16xi32>
    %59 = arith.addi %56, %58 : vector<8x8x16xi32>
    %60 = vector.shape_cast %59 : vector<8x8x16xi32> to vector<64x16xi32>
    %61 = arith.addi %60, %47 : vector<64x16xi32>
    %c0_22 = arith.constant 0 : index
    %c0_23 = arith.constant 0 : index
    %62 = vector.load %arg6[%c0_22, %c0_23] : memref<16x128xf32, #tpu.memory_space<vmem>>, vector<16x128xf32>
    %cst_24 = arith.constant dense<0.000000e+00> : vector<64x128xf32>
    %63 = tpu.matmul %37, %62, %cst_24 {dimension_numbers = #tpu.dot_dimension_numbers<[1], [0], [0], [1], [0, 0, 1, 1], [], []>} : vector<64x16xf32>, vector<16x128xf32>, vector<64x128xf32> -> vector<64x128xf32>
    %64 = arith.addf %30, %63 : vector<64x128xf32>
    %cst_25 = arith.constant 0.000000e+00 : f32
    %65 = vector.broadcast %cst_25 : f32 to vector<64x8xf32>
    %cst_26 = arith.constant 0.000000e+00 : f32
    %66 = vector.broadcast %cst_26 : f32 to vector<64x104xf32>
    %67 = tpu.concatenate %65, %37, %66 in 1 : vector<64x8xf32>, vector<64x16xf32>, vector<64x104xf32> -> vector<64x128xf32>
    %68 = arith.addf %64, %67 : vector<64x128xf32>
    %cst_27 = arith.constant dense<0.000000e+00> : vector<128xf32>
    %69 = vector.multi_reduction <add>, %68, %cst_27 [0] : vector<64x128xf32> to vector<128xf32>
    %70 = vector.shape_cast %69 : vector<128xf32> to vector<1x128xf32>
    %71 = arith.mulf %68, %68 : vector<64x128xf32>
    %cst_28 = arith.constant dense<0.000000e+00> : vector<128xf32>
    %72 = vector.multi_reduction <add>, %71, %cst_28 [0] : vector<64x128xf32> to vector<128xf32>
    %73 = vector.shape_cast %72 : vector<128xf32> to vector<1x128xf32>
    %74 = tpu.concatenate %70, %73 in 0 : vector<1x128xf32>, vector<1x128xf32> -> vector<2x128xf32>
    %75 = vector.shape_cast %74 : vector<2x128xf32> to vector<1x2x128xf32>
    %c0_29 = arith.constant 0 : index
    %c0_30 = arith.constant 0 : index
    %c0_31 = arith.constant 0 : index
    %76 = vector.load %arg8[%c0_29, %c0_30, %c0_31] : memref<1x2x128xf32, #tpu.memory_space<vmem>>, vector<1x2x128xf32>
    tpu.vector_store %arg8[%c0_29, %c0_30, %c0_31], %75 {strides = array<i32>} : memref<1x2x128xf32, #tpu.memory_space<vmem>>, vector<1x2x128xf32>,
    %c0_i32_32 = arith.constant 0 : i32
    %77 = vector.broadcast %c0_i32_32 : i32 to vector<64x24xi32>
    %c0_i32_33 = arith.constant 0 : i32
    %78 = vector.broadcast %c0_i32_33 : i32 to vector<64x88xi32>
    %79 = tpu.concatenate %77, %61, %78 in 1 : vector<64x24xi32>, vector<64x16xi32>, vector<64x88xi32> -> vector<64x128xi32>
    %80 = tpu.bitcast %79 : vector<64x128xi32> -> vector<64x128xf32>
    %81 = tpu.iota {dimensions = array<i32: 1>} : vector<64x128xi32>
    %c24_i32 = arith.constant 24 : i32
    %82 = vector.broadcast %c24_i32 : i32 to vector<64x128xi32>
    %83 = arith.cmpi sge, %81, %82 : vector<64x128xi32>
    %c40_i32 = arith.constant 40 : i32
    %84 = vector.broadcast %c40_i32 : i32 to vector<64x128xi32>
    %85 = arith.cmpi slt, %81, %84 : vector<64x128xi32>
    %86 = arith.andi %83, %85 : vector<64x128xi1>
    %87 = arith.select %86, %80, %68 : vector<64x128xi1>, vector<64x128xf32>
    %c0_34 = arith.constant 0 : index
    %c0_35 = arith.constant 0 : index
    %88 = vector.load %arg7[%c0_34, %c0_35] : memref<64x128xf32, #tpu.memory_space<vmem>>, vector<64x128xf32>
    tpu.vector_store %arg7[%c0_34, %c0_35], %87 {strides = array<i32>} : memref<64x128xf32, #tpu.memory_space<vmem>>, vector<64x128xf32>,
    return
  }
  func.func @transform_0(%arg0: i32, %arg1: i32) -> (i32, i32, i32) {
    %c1_i32 = arith.constant 1 : i32
    %0 = arith.muli %arg0, %c1_i32 : i32
    %1 = arith.addi %0, %arg1 : i32
    %c0_i32 = arith.constant 0 : i32
    %c0_i32_0 = arith.constant 0 : i32
    %c0_i32_1 = arith.constant 0 : i32
    return %1, %c0_i32, %c0_i32_0 : i32, i32, i32
  }
  func.func @transform_1(%arg0: i32, %arg1: i32) -> (i32, i32, i32) {
    %c1_i32 = arith.constant 1 : i32
    %0 = arith.muli %arg0, %c1_i32 : i32
    %1 = arith.addi %0, %arg1 : i32
    %c0_i32 = arith.constant 0 : i32
    %c0_i32_0 = arith.constant 0 : i32
    %c0_i32_1 = arith.constant 0 : i32
    return %1, %c0_i32, %c0_i32_0 : i32, i32, i32
  }
  func.func @transform_2(%arg0: i32, %arg1: i32) -> (i32, i32, i32) {
    %c0_i32 = arith.constant 0 : i32
    %c0_i32_0 = arith.constant 0 : i32
    %c0_i32_1 = arith.constant 0 : i32
    %c0_i32_2 = arith.constant 0 : i32
    return %c0_i32, %c0_i32_0, %c0_i32_1 : i32, i32, i32
  }
  func.func @transform_3(%arg0: i32, %arg1: i32) -> (i32, i32) {
    %c0_i32 = arith.constant 0 : i32
    %c0_i32_0 = arith.constant 0 : i32
    %c0_i32_1 = arith.constant 0 : i32
    return %c0_i32, %c0_i32_0 : i32, i32
  }
  func.func @transform_4(%arg0: i32, %arg1: i32) -> (i32, i32) {
    %c0_i32 = arith.constant 0 : i32
    %c0_i32_0 = arith.constant 0 : i32
    %c0_i32_1 = arith.constant 0 : i32
    return %c0_i32, %c0_i32_0 : i32, i32
  }
  func.func @transform_5(%arg0: i32, %arg1: i32) -> (i32, i32) {
    %c1_i32 = arith.constant 1 : i32
    %0 = arith.muli %arg0, %c1_i32 : i32
    %1 = arith.addi %0, %arg1 : i32
    %c0_i32 = arith.constant 0 : i32
    %c0_i32_0 = arith.constant 0 : i32
    return %1, %c0_i32 : i32, i32
  }
  func.func @transform_6(%arg0: i32, %arg1: i32) -> (i32, i32, i32) {
    %c1_i32 = arith.constant 1 : i32
    %0 = arith.muli %arg0, %c1_i32 : i32
    %1 = arith.addi %0, %arg1 : i32
    %c0_i32 = arith.constant 0 : i32
    %c0_i32_0 = arith.constant 0 : i32
    %c0_i32_1 = arith.constant 0 : i32
    return %1, %c0_i32, %c0_i32_0 : i32, i32, i32
  }
}

</mosaic_0001>

<bundles_post_ra>
// kernel: downsampler_block.3
= control target key start
LH: loop header
LB: loop body
LE: loop exit
PB: predicated region body
PF: predicated region fallthrough
CT: control target
= control target key end

     0   :  { %s261_s0 = inlined_call_operand.vmem [shape: f32[128,128], index: 0, kind: input, shape index: {}]   ;;  %s262_s1 = inlined_call_operand.vmem [shape: f32[1,128], index: 1, kind: input, shape index: {}]   ;;  %s263_s2 = inlined_call_operand.vmem [shape: f32[1,128], index: 2, kind: input, shape index: {}]   ;;  %s264_s3 = inlined_call_operand.hbm [shape: f32[128,128], index: 3, kind: output, shape index: {}]  }
   0x1   :  { %v15_v0 = vld [vmem:[%s261_s0] sm:$0xff]  ;;  %v16_v4 = vld [vmem:[%s261_s0 + $0x8] sm:$0xff]  ;;  %v17_v5 = vld [vmem:[%s261_s0 + $0x10] sm:$0xff] }
   0x2   :  { %v125_v1 = vld [vmem:[%s262_s1] ss:$0 sm:$0xff]  ;;  %v18_v6 = vld [vmem:[%s261_s0 + $0x18] sm:$0xff]  ;;  %v20_v11 = vld [vmem:[%s261_s0 + $0x28] sm:$0xff] }
   0x3   :  { %v186_v2 = vld [vmem:[%s263_s2] ss:$0 sm:$0xff]  ;;  %v38_v3 = vmul.f32 %v125_v1, %v15_v0  ;;  %v39_v7 = vmul.f32 %v125_v1, %v16_v4  ;;  %v40_v8 = vmul.f32 %v125_v1, %v17_v5  ;;  %v41_v9 = vmul.f32 %v125_v1, %v18_v6  ;;  %v21_v12 = vld [vmem:[%s261_s0 + $0x30] sm:$0xff]  ;;  %v22_v17 = vld [vmem:[%s261_s0 + $0x38] sm:$0xff] }
   0x4   :  { %v19_v10 = vld [vmem:[%s261_s0 + $0x20] sm:$0xff]  ;;  %v43_v15 = vmul.f32 %v125_v1, %v20_v11  ;;  %v44_v16 = vmul.f32 %v125_v1, %v21_v12  ;;  %v45_v21 = vmul.f32 %v125_v1, %v22_v17  ;;  %v24_v23 = vld [vmem:[%s261_s0 + $0x48] sm:$0xff]  ;;  %v25_v24 = vld [vmem:[%s261_s0 + $0x50] sm:$0xff] }
   0x5   :  { %v61_v13 = vadd.f32 %v186_v2, %v38_v3  ;;  %v42_v14 = vmul.f32 %v125_v1, %v19_v10  ;;  %v62_v18 = vadd.f32 %v186_v2, %v39_v7  ;;  %v63_v19 = vadd.f32 %v186_v2, %v40_v8  ;;  %v23_v22 = vld [vmem:[%s261_s0 + $0x40] sm:$0xff]  ;;  %v26_v29 = vld [vmem:[%s261_s0 + $0x58] sm:$0xff]  ;;  %v28_v31 = vld [vmem:[%s261_s0 + $0x68] sm:$0xff] }
   0x6   :  { %v64_v20 = vadd.f32 %v186_v2, %v41_v9  ;;  %v66_v27 = vadd.f32 %v186_v2, %v43_v15  ;;  %v67_v28 = vadd.f32 %v186_v2, %v44_v16  ;;  %v27_v30 = vld [vmem:[%s261_s0 + $0x60] sm:$0xff]  ;;  %v68_v35 = vadd.f32 %v186_v2, %v45_v21  ;;  %v29_v36 = vld [vmem:[%s261_s0 + $0x70] sm:$0xff] }
   0x7   :  { %v77_v25 = vmax.f32 %v61_v13, 0.0  ;;  %v65_v26 = vadd.f32 %v186_v2, %v42_v14  ;;  %v78_v32 = vmax.f32 %v62_v18, 0.0  ;;  %v79_v33 = vmax.f32 %v63_v19, 0.0 }
   0x8   :  { %v80_v34 = vmax.f32 %v64_v20, 0.0 }
   0x9   :  { %8 = vsyncpa [#allocation3], 0  ;;  %93 = vst [vmem:[#allocation2] sm:$0xff] %v77_v25  ;;  %v81_v37 = vmax.f32 %v65_v26, 0.0  ;;  %v82_v38 = vmax.f32 %v66_v27, 0.0  ;;  %v83_v39 = vmax.f32 %v67_v28, 0.0  ;;  %v46_v40 = vmul.f32 %v125_v1, %v23_v22 }
   0xa   :  { %v30_v41 = vld [vmem:[%s261_s0 + $0x78] sm:$0xff]  ;;  %94 = vst [vmem:[#allocation2 + $0x8] sm:$0xff] %v78_v32  ;;  %95 = vst [vmem:[#allocation2 + $0x10] sm:$0xff] %v79_v33  ;;  %v84_v42 = vmax.f32 %v68_v35, 0.0  ;;  %v47_v43 = vmul.f32 %v125_v1, %v24_v23  ;;  %v48_v44 = vmul.f32 %v125_v1, %v25_v24  ;;  %v49_v45 = vmul.f32 %v125_v1, %v26_v29  ;;  %s154_s0 = smov [#allocation2]  }
   0xb   :  { %96 = vst [vmem:[#allocation2 + $0x18] sm:$0xff] %v80_v34  ;;  %97 = vst [vmem:[#allocation2 + $0x20] sm:$0xff] %v81_v37  ;;  %v69_v46 = vadd.f32 %v186_v2, %v46_v40  ;;  %v50_v47 = vmul.f32 %v125_v1, %v27_v30  ;;  %v51_v48 = vmul.f32 %v125_v1, %v28_v31  ;;  %s114_s19 = sshll.u32 %s154_s0, 4  ;;  %s115_s19 = int_to_ptr.vmem [resolvable:$true] %s114_s19 }
   0xc   :  { %98 = vst [vmem:[#allocation2 + $0x28] sm:$0xff] %v82_v38  ;;  %99 = vst [vmem:[#allocation2 + $0x30] sm:$0xff] %v83_v39  ;;  %v52_v49 = vmul.f32 %v125_v1, %v29_v36  ;;  %v70_v50 = vadd.f32 %v186_v2, %v47_v43  ;;  %v71_v51 = vadd.f32 %v186_v2, %v48_v44  ;;  %s130_s20 = scalar_lea.vmem %s115_s19, 2048  ;;  %p135_p1 = scmp.lt.s32.totalorder %s115_s19, %s115_s19 }
   0xd   :  { %100 = vst [vmem:[#allocation2 + $0x38] sm:$0xff] %v84_v42  ;;  %v72_v52 = vadd.f32 %v186_v2, %v49_v45  ;;  %v53_v53 = vmul.f32 %v125_v1, %v30_v41  ;;  %v85_v54 = vmax.f32 %v69_v46, 0.0  ;;  %v73_v55 = vadd.f32 %v186_v2, %v50_v47  ;;  %p131_p0 = scmp.ne.s32.totalorder %s115_s19, %s130_s20  ;;  %p136_p2 = scmp.lt.s32.totalorder %s130_s20, %s130_s20 }
   0xe   :  { %v74_v56 = vadd.f32 %v186_v2, %v51_v48  ;;  %v75_v57 = vadd.f32 %v186_v2, %v52_v49  ;;  %v86_v58 = vmax.f32 %v70_v50, 0.0  ;;  %v87_v59 = vmax.f32 %v71_v51, 0.0 }
   0xf   :  { %v88_v60 = vmax.f32 %v72_v52, 0.0  ;;  %v76_v61 = vadd.f32 %v186_v2, %v53_v53  ;;  %101 = vst [vmem:[#allocation2 + $0x40] sm:$0xff] %v85_v54  ;;  %v89_v62 = vmax.f32 %v73_v55, 0.0  ;;  %p137_p3 = por %p136_p2, %p135_p1 }
  0x10   :  { %v90_v63 = vmax.f32 %v74_v56, 0.0  ;;  %v91_v0 = vmax.f32 %v75_v57, 0.0  ;;  %102 = vst [vmem:[#allocation2 + $0x48] sm:$0xff] %v86_v58  ;;  %103 = vst [vmem:[#allocation2 + $0x50] sm:$0xff] %v87_v59 }
  0x11   :  { %104 = vst [vmem:[#allocation2 + $0x58] sm:$0xff] %v88_v60  ;;  %v92_v1 = vmax.f32 %v76_v61, 0.0  ;;  %105 = vst [vmem:[#allocation2 + $0x60] sm:$0xff] %v89_v62  ;;  %p138_p4 = pnand %p137_p3, %p131_p0 }
  0x12   :  { %106 = vst [vmem:[#allocation2 + $0x68] sm:$0xff] %v90_v63  ;;  %107 = vst [vmem:[#allocation2 + $0x70] sm:$0xff] %v91_v0 }
  0x13   :  { %108 = vst [vmem:[#allocation2 + $0x78] sm:$0xff] %v92_v1 }
  0x14   :  { %141 = shalt.err (!%p138_p4)
}
  0x15   :  { %s142_s23 = scalar_lea.hbm %s264_s3, 2048 }
  0x16   :  { %p143_p5 = scmp.ne.s32.totalorder %s264_s3, %s142_s23  ;;  %p146_p6 = scmp.lt.u32.totalorder %s142_s23, %s264_s3 }
  0x18   :  { %p148_p7 = pnand %p146_p6, %p143_p5 }
  0x1a   :  { %151 = shalt.err (!%p148_p7)
}
  0x1b   :  { %s155_s26 = smov 128   ;;  %s156_s27 = smov 8  }
  0x1c   :  { %120 = dma.vmem_to_hbm [thread:$0]  %s115_s19, 2048, %s264_s3, [#allocation3], %s155_s26, %s155_s26, %s156_s27  }
  0x1d   :  { %152 = dma.done.wait [#allocation3], 2048  }
  0x1e   :  { %153 = vsyncadd [#allocation3], 4294965248 }
  0x1f   :  { %124 = vsyncpa [#allocation3], 1 }

// kernel: downsampler_block.2
= control target key start
LH: loop header
LB: loop body
LE: loop exit
PB: predicated region body
PF: predicated region fallthrough
CT: control target
= control target key end

     0   :  { %s2030_s21 = smov 0   ;;  %s2032_s22 = smov 0   ;;  %s2617_s0 = inlined_call_operand.vmem [shape: f32[16,8,64], index: 0, kind: input, shape index: {}]   ;;  %s2618_s1 = inlined_call_operand.vmem [shape: f32[2,8,64], index: 1, kind: input, shape index: {}]   ;;  %s2619_s2 = inlined_call_operand.vmem [shape: f32[4,64,128], index: 2, kind: input, shape index: {}]   ;;  %s2620_s3 = inlined_call_operand.vmem [shape: f32[1,128], index: 3, kind: input, shape index: {}]   ;;  %s2621_s4 = inlined_call_operand.vmem [shape: f32[16,128], index: 4, kind: input, shape index: {}]   ;;  %s2622_s5 = inlined_call_operand.vmem [shape: f32[128,128], index: 5, kind: output, shape index: {0}]   ;;  %s2623_s6 = inlined_call_operand.vmem [shape: f32[2,2,128], index: 6, kind: output, shape index: {1}]  }
   0x1   :  { %s2034_s23 = smov 0  }
   0x2 LB: > { %s29_s24 = sadd.s32 1, %s1981_s22  ;;  %p1539_p0 = scmp.ge.s32.totalorder %s1985_s23, 1  ;;  %s1985_s23 = sphi %s2034_s23, %s17_s23   ;;  %s1981_s22 = sphi %s2032_s22, %s2627_s22   ;;  %s1977_s21 = sphi %s2030_s21, %s2626_s21  }
   0x3   : > { %p31_p1 = scmp.ge.s32.totalorder %s29_s24, 2  ;;  %p249_p2 = scmp.lt.s32.totalorder %s1985_s23, 3 }
   0x5   : > { %s2629_s24 = smov (%p31_p1, %s29_s24), 0  ;;  %p250_p3 = pnand %p1539_p0, %p249_p2 }
   0x6   : > { %s1540_s25 = sshll.u32 (!%p250_p3), %s1977_s21, 3  ;;  %s1987_s30 = smov (!%p250_p3), 112   ;;  %v1546_v8 = vld [vmem:[%s2619_s2 + $0x40] sm:$0xff] (!%p250_p3)  ;;  %v1547_v9 = vld [vmem:[%s2619_s2 + $0x48] sm:$0xff] (!%p250_p3)  ;;  %v1548_v14 = vld [vmem:[%s2619_s2 + $0x50] sm:$0xff] (!%p250_p3)  ;;  %vm352_vm0 = vcmask (!%p250_p3), 1040384  }
   0x7   : > { %253 = sbr.rel (%p250_p3) target bundleno = 537 (0x219), region = 40  ;;  %p293_p4 = scmp.lt.s32.totalorder (!%p250_p3), %s1540_s25, 15  ;;  %v1570_v10 = vld [vmem:[%s2619_s2 + $0x80] sm:$0xff] (!%p250_p3)  ;;  %v1815_v12 = vpack.c.bf16 (!%p250_p3), %v1547_v9, %v1546_v8  ;;  %v1571_v13 = vld [vmem:[%s2619_s2 + $0x88] sm:$0xff] (!%p250_p3)  ;;  %v1549_v15 = vld [vmem:[%s2619_s2 + $0x58] sm:$0xff] (!%p250_p3)  ;;  %vm382_vm1 = vcmask (!%p250_p3), 523264  }
   0x8   : > { %p300_p5 = scmp.lt.s32.totalorder (!%p250_p3), %s1977_s21, 1  ;;  %v1847_v16 = vpack.c.bf16 (!%p250_p3), %v1571_v13, %v1570_v10  ;;  %v1819_v17 = vpack.c.bf16 (!%p250_p3), %v1549_v15, %v1548_v14  ;;  %v1572_v18 = vld [vmem:[%s2619_s2 + $0x90] sm:$0xff] (!%p250_p3)  ;;  %v1573_v19 = vld [vmem:[%s2619_s2 + $0x98] sm:$0xff] (!%p250_p3)  ;;  %v1550_v20 = vld [vmem:[%s2619_s2 + $0x60] sm:$0xff] (!%p250_p3)  ;;  %s1988_s11 = smov (!%p250_p3), 96   ;;  %vm1135_vm2 = vcmask (!%p250_p3), 130048  }
   0x9   : > { %1816 = vmatprep.subr.bf16.mxu1 (!%p250_p3), %v1815_v12  ;;  %v1851_v22 = vpack.c.bf16 (!%p250_p3), %v1573_v19, %v1572_v18  ;;  %v1551_v23 = vld [vmem:[%s2619_s2 + $0x68] sm:$0xff] (!%p250_p3)  ;;  %v1574_v24 = vld [vmem:[%s2619_s2 + $0xa0] sm:$0xff] (!%p250_p3)  ;;  %v1552_v28 = vld [vmem:[%s2619_s2 + $0x70] sm:$0xff] (!%p250_p3)  ;;  %s1989_s12 = smov (!%p250_p3), 16   ;;  %s1990_s13 = smov (!%p250_p3), 32  }
   0xa   : > { %v1575_v25 = vld [vmem:[%s2619_s2 + $0xa8] sm:$0xff] (!%p250_p3)  ;;  %1818 = vmatpush3.bf16.msra.mxu1 (!%p250_p3), %v1815_v12  ;;  %1848 = vmatprep.subr.bf16.mxu0 (!%p250_p3), %v1847_v16  ;;  %v1823_v26 = vpack.c.bf16 (!%p250_p3), %v1551_v23, %v1550_v20  ;;  %v1553_v29 = vld [vmem:[%s2619_s2 + $0x78] sm:$0xff] (!%p250_p3)  ;;  %v1576_v31 = vld [vmem:[%s2619_s2 + $0xb0] sm:$0xff] (!%p250_p3) }
   0xb   : > { %1820 = vmatprep.subr.bf16.mxu1 (!%p250_p3), %v1819_v17  ;;  %1850 = vmatpush3.bf16.msra.mxu0 (!%p250_p3), %v1847_v16  ;;  %v1855_v27 = vpack.c.bf16 (!%p250_p3), %v1575_v25, %v1574_v24  ;;  %v1577_v32 = vld [vmem:[%s2619_s2 + $0xb8] sm:$0xff] (!%p250_p3)  ;;  %v1827_v33 = vpack.c.bf16 (!%p250_p3), %v1553_v29, %v1552_v28  ;;  %v365_v35 = vld [vmem:[%s2619_s2] sm:$0xff] (!%p250_p3)  ;;  %v366_v36 = vld [vmem:[%s2619_s2 + $0x8] sm:$0xff] (!%p250_p3) }
   0xc   : > { %1852 = vmatprep.subr.bf16.mxu0 (!%p250_p3), %v1851_v22  ;;  %v1859_v34 = vpack.c.bf16 (!%p250_p3), %v1577_v32, %v1576_v31  ;;  %v1586_v37 = vld [vmem:[%s2619_s2 + $0xc0] sm:$0xff] (!%p250_p3)  ;;  %v1587_v38 = vld [vmem:[%s2619_s2 + $0xc8] sm:$0xff] (!%p250_p3)  ;;  %v1831_v39 = vpack.c.bf16 (!%p250_p3), %v366_v36, %v365_v35  ;;  %v367_v42 = vld [vmem:[%s2619_s2 + $0x10] sm:$0xff] (!%p250_p3) }
   0xd   : > { %v2170_v41 = vpack.c.bf16 (!%p250_p3), %v1587_v38, %v1586_v37  ;;  %v368_v43 = vld [vmem:[%s2619_s2 + $0x18] sm:$0xff] (!%p250_p3)  ;;  %v1588_v45 = vld [vmem:[%s2619_s2 + $0xd0] sm:$0xff] (!%p250_p3)  ;;  %v369_v50 = vld [vmem:[%s2619_s2 + $0x20] sm:$0xff] (!%p250_p3) }
   0xe   : > { %s2631_s25 = smov (!%p293_p4, %s1540_s25), 15  ;;  %s2633_s21 = smov (!%p300_p5, %s1977_s21), 1  ;;  %1822 = vmatpush3.bf16.msra.mxu1 %v1819_v17  ;;  %v1589_v46 = vld [vmem:[%s2619_s2 + $0xd8] sm:$0xff]  ;;  %v1835_v47 = vpack.c.bf16 %v368_v43, %v367_v42  ;;  %v370_v51 = vld [vmem:[%s2619_s2 + $0x28] sm:$0xff]  ;;  %v1590_v55 = vld [vmem:[%s2619_s2 + $0xe0] sm:$0xff] }
   0xf   : > { %s1541_s26 = sshll.u32 %s2631_s25, 3  ;;  %s1542_s14 = sshll.u32 %s2633_s21, 3  ;;  %1824 = vmatprep.subr.bf16.mxu1 %v1823_v26  ;;  %1854 = vmatpush3.bf16.msra.mxu0 %v1851_v22  ;;  %v1867_v53 = vpack.c.bf16 %v1589_v46, %v1588_v45  ;;  %v1591_v56 = vld [vmem:[%s2619_s2 + $0xe8] sm:$0xff]  ;;  %v1839_v57 = vpack.c.bf16 %v370_v51, %v369_v50  ;;  %v371_v60 = vld [vmem:[%s2619_s2 + $0x30] sm:$0xff]  ;;  %v372_v61 = vld [vmem:[%s2619_s2 + $0x38] sm:$0xff] }
  0x10   : > { %s296_s29 = scalar_lea.vmem %s2617_s0, %s1541_s26  ;;  %s303_s17 = scalar_lea.vmem %s2618_s1, %s1542_s14  ;;  %1856 = vmatprep.subr.bf16.mxu0 %v1855_v27  ;;  %v1871_v63 = vpack.c.bf16 %v1591_v56, %v1590_v55  ;;  %v1592_v9 = vld [vmem:[%s2619_s2 + $0xf0] sm:$0xff]  ;;  %v1593_v10 = vld [vmem:[%s2619_s2 + $0xf8] sm:$0xff]  ;;  %v1133_v19 = vld [vmem:[%s2621_s4] sm:$0xff]  ;;  %v1991_v55 = vmov 16  }
  0x11   : > { %v2059_v0 = vld [vmem:[%s296_s29] sm:$0xff]  ;;  %v2061_v1 = vld [vmem:[%s296_s29 + $0x10] sm:$0xff]  ;;  %v2067_v2 = vld [vmem:[%s296_s29 + $0x8] sm:$0xff]  ;;  %v1875_v16 = vpack.c.bf16 %v1593_v10, %v1592_v9  ;;  %s1994_s14 = smov 120   ;;  %s2558_s28 = scalar_lea.vmem %s2622_s5, %s1541_s26 }
  0x12   : > { %897 = vrot.lane.b32.xlu0 %v2059_v0, %s1987_s30  ;;  %901 = vrot.lane.b32.xlu1 %v2061_v1, %s1987_s30  ;;  %v2069_v3 = vld [vmem:[%s296_s29 + $0x18] sm:$0xff]  ;;  %v2075_v4 = vld [vmem:[%s296_s29 + $0x20] sm:$0xff]  ;;  %v336_v11 = vrot.slane %v2059_v0, 7  ;;  %v337_v40 = vrot.slane %v2067_v2, 7  ;;  %v338_v44 = vrot.slane %v2061_v1, 7 }
  0x13   : > { %v2077_v5 = vld [vmem:[%s296_s29 + $0x28] sm:$0xff]  ;;  %v2083_v6 = vld [vmem:[%s296_s29 + $0x30] sm:$0xff]  ;;  %v2085_v7 = vld [vmem:[%s296_s29 + $0x38] sm:$0xff]  ;;  %1826 = vmatpush3.bf16.msra.mxu1 %v1823_v26  ;;  %1858 = vmatpush3.bf16.msra.mxu0 %v1855_v27  ;;  %v339_v49 = vrot.slane %v2069_v3, 7  ;;  %v340_v54 = vrot.slane %v2075_v4, 7 }
  0x14   : > { %v2124_v21 = vsel %vm352_vm0, 0.0, %v336_v11  ;;  %v2147_v30 = vld [vmem:[%s303_s17] sm:$0xff]  ;;  %1828 = vmatprep.subr.bf16.mxu1 %v1827_v33  ;;  %1860 = vmatprep.subr.bf16.mxu0 %v1859_v34  ;;  %v2186_v48 = vsel %vm352_vm0, 0.0, %v337_v40  ;;  %v355_v52 = vsel %vm352_vm0, 0.0, %v338_v44  ;;  %v341_v59 = vrot.slane %v2077_v5, 7  ;;  %v1134_v20 = vld [vmem:[%s2621_s4 + $0x8] sm:$0xff] }
  0x15   : > { %1759 = vmatprep.mubr.msk.f32.mxu0 %vm382_vm1, %v2124_v21  ;;  %1703 = vmatprep.mubr.msk.f32.mxu1 %vm382_vm1, %v2147_v30  ;;  %v356_v58 = vsel %vm352_vm0, 0.0, %v339_v49  ;;  %v357_v62 = vsel %vm352_vm0, 0.0, %v340_v54  ;;  %v342_v8 = vrot.slane %v2083_v6, 7  ;;  %v1843_v11 = vpack.c.bf16 %v372_v61, %v371_v60  ;;  %s1545_s17 = sshll.u32 %s2633_s21, 1 }
  0x16   : > { %899 = vrot.lane.b32.xlu0 %v2067_v2, %s1987_s30  ;;  %903 = vrot.lane.b32.xlu1 %v2069_v3, %s1987_s30  ;;  %v358_v12 = vsel %vm352_vm0, 0.0, %v341_v59  ;;  %v343_v13 = vrot.slane %v2085_v7, 7  ;;  %v362_v14 = vrot.slane %v2147_v30, 7  ;;  %s317_s20 = scalar_lea.vmem %s2623_s6, %s1545_s17 }
  0x17   : > { %1830 = vmatpush3.bf16.msra.mxu1 %v1827_v33  ;;  %1862 = vmatpush3.bf16.msra.mxu0 %v1859_v34  ;;  %v359_v15 = vsel %vm352_vm0, 0.0, %v342_v8 }
  0x18   : > { %1832 = vmatprep.subr.bf16.mxu1 %v1831_v39  ;;  %1864 = vmatprep.subr.bf16.mxu0 %v2170_v41  ;;  %v360_v17 = vsel %vm352_vm0, 0.0, %v343_v13  ;;  %v364_v18 = vsel %vm352_vm0, 0.0, %v362_v14  ;;  %v1992_v14 = vmov 0  }
  0x1a   : > { %905 = vrot.lane.b32.xlu0 %v2075_v4, %s1987_s30  ;;  %907 = vrot.lane.b32.xlu1 %v2077_v5, %s1987_s30 }
  0x1b   : > { %1704 = vmatmul.mubr.msk.f32.vlgmr.msra.gmra.mrb[0].mxu1 %vm382_vm1, %v2059_v0  ;;  %1760 = vmatmul.mubr.msk.f32.vlgmr.msra.gmra.mrb[0].mxu0 %vm382_vm1, %v2186_v48 }
  0x1c   : > { %1834 = vmatpush3.bf16.msra.mxu1 %v1831_v39  ;;  %1706 = vmatprep.mubr.msk.f32.mxu1 %vm382_vm1, %v2067_v2 }
  0x1d   : > { %1836 = vmatprep.subr.bf16.mxu1 %v1835_v47  ;;  %1866 = vmatpush3.bf16.msra.mxu0 %v2170_v41 }
  0x1e   : > { %909 = vrot.lane.b32.xlu0 %v2083_v6, %s1987_s30  ;;  %911 = vrot.lane.b32.xlu1 %v2085_v7, %s1987_s30 }
  0x1f   : > { %1762 = vmatprep.mubr.msk.f32.mxu0 %vm382_vm1, %v355_v52  ;;  %1707 = vmatmul.mubr.msk.f32.gmra.mrb[2].mxu1 %vm382_vm1, %v2061_v1 }
  0x20   : > { %1868 = vmatprep.subr.bf16.mxu0 %v1867_v53  ;;  %1838 = vmatpush3.bf16.msra.mxu1 %v1835_v47 }
  0x21   : > { %1709 = vmatprep.mubr.msk.f32.mxu1 %vm382_vm1, %v2069_v3  ;;  %1763 = vmatmul.mubr.msk.f32.gmra.mrb[2].mxu0 %vm382_vm1, %v356_v58 }
  0x22   : > { %1840 = vmatprep.subr.bf16.mxu1 %v1839_v57  ;;  %1870 = vmatpush3.bf16.msra.mxu0 %v1867_v53 }
  0x23   : > { %1765 = vmatprep.mubr.msk.f32.mxu0 %vm382_vm1, %v357_v62  ;;  %1710 = vmatmul.mubr.msk.f32.gmra.mrb[4].mxu1 %vm382_vm1, %v2075_v4 }
  0x24   : > { %1872 = vmatprep.subr.bf16.mxu0 %v1871_v63  ;;  %1842 = vmatpush3.bf16.msra.mxu1 %v1839_v57 }
  0x25   : > { %1712 = vmatprep.mubr.msk.f32.mxu1 %vm382_vm1, %v2077_v5  ;;  %1766 = vmatmul.mubr.msk.f32.gmra.mrb[4].mxu0 %vm382_vm1, %v358_v12 }
  0x26   : > { %1844 = vmatprep.subr.bf16.mxu1 %v1843_v11  ;;  %1874 = vmatpush3.bf16.msra.mxu0 %v1871_v63 }
  0x27   : > { %1768 = vmatprep.mubr.msk.f32.mxu0 %vm382_vm1, %v359_v15  ;;  %1713 = vmatmul.mubr.msk.f32.gmra.mrb[6].mxu1 %vm382_vm1, %v2083_v6 }
  0x28   : > { %1876 = vmatprep.subr.bf16.mxu0 %v1875_v16  ;;  %1846 = vmatpush3.bf16.msra.mxu1 %v1843_v11 }
  0x29   : > { %1731 = vmatprep.mubr.msk.f32.mxu1 %vm382_vm1, %v2059_v0  ;;  %1769 = vmatmul.mubr.msk.f32.gmra.mrb[6].mxu0 %vm382_vm1, %v360_v17 }
  0x2a   : > { %1883 = vmatprep.subr.bf16.mxu1 %v2170_v41  ;;  %1878 = vmatpush3.bf16.msra.mxu0 %v1875_v16 }
  0x2b   : > { %1787 = vmatprep.mubr.msk.f32.mxu0 %vm382_vm1, %v364_v18  ;;  %1732 = vmatmul.mubr.msk.f32.vlgmr.msra.gmra.mrb[0].mxu1 %vm382_vm1, %v2067_v2 }
  0x2c   : > { %1887 = vmatpush3.bf16.msra.mxu1 %v2170_v41  ;;  %1734 = vmatprep.mubr.msk.f32.mxu1 %vm382_vm1, %v2061_v1 }
  0x2d   : > { %1788 = vmatmul.mubr.msk.f32.vlgmr.msra.gmra.mrb[0].mxu0 %vm382_vm1, %v2124_v21  ;;  %1884 = vmatprep.subr.bf16.mxu1 %v1867_v53  ;;  %v1879_v21 = vpack.c.bf16 %v1134_v20, %v1133_v19 }
  0x2e   : > { %1790 = vmatprep.mubr.msk.f32.mxu0 %vm382_vm1, %v2186_v48 }
  0x2f   : > { %1735 = vmatmul.mubr.msk.f32.gmra.mrb[2].mxu1 %vm382_vm1, %v2069_v3  ;;  %1880 = vmatprep.subr.bf16.mxu0 %v1879_v21 }
  0x30   : > { %1888 = vmatpush3.bf16.msra.mxu1 %v1867_v53  ;;  %1737 = vmatprep.mubr.msk.f32.mxu1 %vm382_vm1, %v2075_v4 }
  0x31   : > { %1791 = vmatmul.mubr.msk.f32.gmra.mrb[2].mxu0 %vm382_vm1, %v355_v52  ;;  %1885 = vmatprep.subr.bf16.mxu1 %v1871_v63 }
  0x32   : > { %1882 = vmatpush3.bf16.msra.mxu0 %v1879_v21 }
  0x33   : > { %1738 = vmatmul.mubr.msk.f32.gmra.mrb[4].mxu1 %vm382_vm1, %v2077_v5 }
  0x34   : > { %1889 = vmatpush3.bf16.msra.mxu1 %v1871_v63  ;;  %1740 = vmatprep.mubr.msk.f32.mxu1 %vm382_vm1, %v2083_v6 }
  0x35   : > { %1886 = vmatprep.subr.bf16.mxu1 %v1875_v16 }
  0x37   : > { %1741 = vmatmul.mubr.msk.f32.gmra.mrb[6].mxu1 %vm382_vm1, %v2085_v7 }
  0x38   : > { %1890 = vmatpush3.bf16.msra.mxu1 %v1875_v16  ;;  %1793 = vmatprep.mubr.msk.f32.mxu1 %vm382_vm1, %v356_v58 }
  0x3b   : > { %1794 = vmatmul.mubr.msk.f32.vlgmr.msra.gmra.mrb[8].mxu1 %vm382_vm1, %v357_v62 }
  0x3c   : > { %1796 = vmatprep.mubr.msk.f32.mxu1 %vm382_vm1, %v358_v12 }
  0x3f   : > { %1797 = vmatmul.mubr.msk.f32.gmra.mrb[10].mxu1 %vm382_vm1, %v359_v15 }
  0x84   : > { %v898_v22 = vpop.permute.xlu0 %897  ;;  %v902_v23 = vpop.permute.xlu1 %901 }
  0x85   : > { %v2284_v24 = vmax.f32 %v2059_v0, %v898_v22  ;;  %v2288_v25 = vmax.f32 %v2061_v1, %v902_v23 }
  0x87   : > { %937 = vrot.lane.b32.xlu0 %v2284_v24, %s1988_s11 }
  0x88   : > { %v900_v26 = vpop.permute.xlu0 %899  ;;  %v904_v27 = vpop.permute.xlu1 %903 }
  0x89   : > { %v2291_v28 = vmax.f32 %v2067_v2, %v900_v26  ;;  %v2296_v29 = vmax.f32 %v2069_v3, %v904_v27 }
  0x8b   : > { %941 = vrot.lane.b32.xlu0 %v2288_v25, %s1988_s11  ;;  %939 = vrot.lane.b32.xlu1 %v2291_v28, %s1988_s11 }
  0x8c   : > { %v906_v30 = vpop.permute.xlu0 %905  ;;  %v908_v31 = vpop.permute.xlu1 %907 }
  0x8d   : > { %v2299_v32 = vmax.f32 %v2075_v4, %v906_v30  ;;  %v2304_v33 = vmax.f32 %v2077_v5, %v908_v31 }
  0x8f   : > { %943 = vrot.lane.b32.xlu1 %v2296_v29, %s1988_s11  ;;  %945 = vrot.lane.b32.xlu0 %v2299_v32, %s1988_s11 }
  0x90   : > { %v910_v34 = vpop.permute.xlu0 %909  ;;  %v912_v35 = vpop.permute.xlu1 %911 }
  0x91   : > { %v2307_v36 = vmax.f32 %v2083_v6, %v910_v34  ;;  %v2312_v37 = vmax.f32 %v2085_v7, %v912_v35 }
  0x93   : > { %947 = vrot.lane.b32.xlu1 %v2304_v33, %s1988_s11  ;;  %949 = vrot.lane.b32.xlu0 %v2307_v36, %s1988_s11 }
  0x97   : > { %951 = vrot.lane.b32.xlu1 %v2312_v37, %s1988_s11  ;;  %969 = vrot.lane.b32.xlu0 %v2059_v0, %s1989_s12 }
  0x9b   : > { %971 = vrot.lane.b32.xlu1 %v2067_v2, %s1989_s12  ;;  %973 = vrot.lane.b32.xlu0 %v2061_v1, %s1989_s12 }
  0x9f   : > { %975 = vrot.lane.b32.xlu1 %v2069_v3, %s1989_s12  ;;  %977 = vrot.lane.b32.xlu0 %v2075_v4, %s1989_s12 }
  0xa3   : > { %979 = vrot.lane.b32.xlu1 %v2077_v5, %s1989_s12  ;;  %981 = vrot.lane.b32.xlu0 %v2083_v6, %s1989_s12 }
  0xa7   : > { %983 = vrot.lane.b32.xlu1 %v2085_v7, %s1989_s12  ;;  %1017 = vrot.lane.b32.xlu0 %v2284_v24, %s1990_s13 }
  0xab   : > { %1019 = vrot.lane.b32.xlu1 %v2291_v28, %s1990_s13  ;;  %1021 = vrot.lane.b32.xlu0 %v2288_v25, %s1990_s13 }
  0xaf   : > { %1023 = vrot.lane.b32.xlu1 %v2296_v29, %s1990_s13  ;;  %1025 = vrot.lane.b32.xlu0 %v2299_v32, %s1990_s13 }
  0xb3   : > { %1027 = vrot.lane.b32.xlu1 %v2304_v33, %s1990_s13  ;;  %1029 = vrot.lane.b32.xlu0 %v2307_v36, %s1990_s13 }
  0xb7   : > { %1031 = vrot.lane.b32.xlu1 %v2312_v37, %s1990_s13 }
  0xf9   : > { %v938_v38 = vpop.permute.xlu0 %937 }
  0xfa   : > { %v2340_v39 = vmax.f32 %v2284_v24, %v938_v38 }
  0xfc   : > { %1803 = vmatprep.mubr.msk.f32.mxu0 %vm1135_vm2, %v2340_v39 }
  0xfd   : > { %v940_v40 = vpop.permute.xlu1 %939  ;;  %v942_v41 = vpop.permute.xlu0 %941 }
  0xfe   : > { %v2345_v42 = vmax.f32 %v2291_v28, %v940_v40  ;;  %v2348_v43 = vmax.f32 %v2288_v25, %v942_v41 }
 0x100   : > { %1804 = vmatmul.mubr.msk.f32.vlgmr.msra.gmra.mrb[0].mxu0 %vm1135_vm2, %v2345_v42 }
 0x101   : > { %v944_v44 = vpop.permute.xlu1 %943  ;;  %v946_v45 = vpop.permute.xlu0 %945  ;;  %1806 = vmatprep.mubr.msk.f32.mxu0 %vm1135_vm2, %v2348_v43 }
 0x102   : > { %v2355_v46 = vmax.f32 %v2296_v29, %v944_v44  ;;  %v2358_v47 = vmax.f32 %v2299_v32, %v946_v45 }
 0x104   : > { %1807 = vmatmul.mubr.msk.f32.gmra.mrb[2].mxu0 %vm1135_vm2, %v2355_v46 }
 0x105   : > { %v948_v48 = vpop.permute.xlu1 %947  ;;  %v950_v49 = vpop.permute.xlu0 %949  ;;  %1809 = vmatprep.mubr.msk.f32.mxu0 %vm1135_vm2, %v2358_v47 }
 0x106   : > { %v2365_v50 = vmax.f32 %v2304_v33, %v948_v48  ;;  %v2368_v51 = vmax.f32 %v2307_v36, %v950_v49 }
 0x108   : > { %1810 = vmatmul.mubr.msk.f32.gmra.mrb[8].mxu0 %vm1135_vm2, %v2365_v50 }
 0x109   : > { %v952_v52 = vpop.permute.xlu1 %951  ;;  %v970_v53 = vpop.permute.xlu0 %969  ;;  %1812 = vmatprep.mubr.msk.f32.mxu0 %vm1135_vm2, %v2368_v51 }
 0x10a   : > { %v2375_v54 = vmax.f32 %v2312_v37, %v952_v52  ;;  %vm993_vm3 = vcmp.gt.f32.partialorder %v2059_v0, %v970_v53 }
 0x10b   : > { %v1009_v56 = vsel %vm993_vm3, 17, %v1991_v55  ;;  %v1001_v15 = vsel %vm993_vm3, 1, %v1992_v14 }
 0x10c   : > { %1049 = vrot.lane.b32.xlu0 %v1009_v56, %s1987_s30  ;;  %1813 = vmatmul.mubr.msk.f32.gmra.mrb[10].mxu0 %vm1135_vm2, %v2375_v54 }
 0x10d   : > { %v972_v57 = vpop.permute.xlu1 %971  ;;  %v974_v58 = vpop.permute.xlu0 %973 }
 0x10e   : > { %vm994_vm4 = vcmp.gt.f32.partialorder %v2067_v2, %v972_v57  ;;  %vm995_vm5 = vcmp.gt.f32.partialorder %v2061_v1, %v974_v58 }
 0x10f   : > { %v1010_v59 = vsel %vm994_vm4, 17, %v1991_v55  ;;  %v1011_v60 = vsel %vm995_vm5, 17, %v1991_v55  ;;  %v1002_v17 = vsel %vm994_vm4, 1, %v1992_v14  ;;  %v1003_v18 = vsel %vm995_vm5, 1, %v1992_v14 }
 0x110   : > { %1051 = vrot.lane.b32.xlu1 %v1010_v59, %s1987_s30  ;;  %1053 = vrot.lane.b32.xlu0 %v1011_v60, %s1987_s30  ;;  %v1098_v59 = vlaneseq  ;;  %vm1297_vm4 = vcmask 64512   ;;  %vm1306_vm5 = vcmask 195584  }
 0x111   : > { %v976_v61 = vpop.permute.xlu1 %975  ;;  %v978_v62 = vpop.permute.xlu0 %977 }
 0x112   : > { %vm996_vm6 = vcmp.gt.f32.partialorder %v2069_v3, %v976_v61  ;;  %vm997_vm7 = vcmp.gt.f32.partialorder %v2075_v4, %v978_v62  ;;  %v2438_v4 = vpop.f32.mrb[0].mxu1  ;;  %v1099_v62 = vshrl.u32 %v1098_v59, 7 }
 0x113   : > { %v1012_v63 = vsel %vm996_vm6, 17, %v1991_v55  ;;  %v1013_v8 = vsel %vm997_vm7, 17, %v1991_v55  ;;  %v1004_v0 = vsel %vm996_vm6, 1, %v1992_v14  ;;  %v1005_v19 = vsel %vm997_vm7, 1, %v1992_v14 }
 0x114   : > { %1055 = vrot.lane.b32.xlu1 %v1012_v63, %s1987_s30  ;;  %1057 = vrot.lane.b32.xlu0 %v1013_v8, %s1987_s30 }
 0x115   : > { %v980_v9 = vpop.permute.xlu1 %979  ;;  %v982_v10 = vpop.permute.xlu0 %981 }
 0x116   : > { %vm998_vm8 = vcmp.gt.f32.partialorder %v2077_v5, %v980_v9  ;;  %vm999_vm9 = vcmp.gt.f32.partialorder %v2083_v6, %v982_v10  ;;  %v1767_v5 = vpop.f32.mrb[4].mxu0  ;;  %v2440_v6 = vpop.f32.mrb[1].mxu1  ;;  %v1116_v9 = vmul.u32 2, %v1099_v62 }
 0x117   : > { %v1014_v11 = vsel %vm998_vm8, 17, %v1991_v55  ;;  %v1015_v12 = vsel %vm999_vm9, 17, %v1991_v55  ;;  %v1006_v2 = vsel %vm998_vm8, 1, %v1992_v14  ;;  %v1007_v1 = vsel %vm999_vm9, 1, %v1992_v14  ;;  %v730_v20 = vpop.f32.mrb[5].mxu0  ;;  %v2442_v21 = vpop.f32.mrb[2].mxu1 }
 0x118   : > { %1059 = vrot.lane.b32.xlu1 %v1014_v11, %s1987_s30  ;;  %1061 = vrot.lane.b32.xlu0 %v1015_v12, %s1987_s30  ;;  %v1770_v22 = vpop.f32.mrb[6].mxu0  ;;  %vm1383_vm8 = vcmask 326656  }
 0x119   : > { %v984_v13 = vpop.permute.xlu1 %983  ;;  %v740_v23 = vpop.f32.mrb[7].mxu0 }
 0x11a   : > { %vm1000_vm10 = vcmp.gt.f32.partialorder %v2085_v7, %v984_v13  ;;  %v2444_v7 = vpop.f32.mrb[3].mxu1  ;;  %v1018_v48 = vpop.permute.xlu0 %1017 }
 0x11b   : > { %v1016_v16 = vsel %vm1000_vm10, 17, %v1991_v55  ;;  %v1008_v3 = vsel %vm1000_vm10, 1, %v1992_v14  ;;  %v1739_v26 = vpop.f32.mrb[4].mxu1  ;;  %vm1041_vm11 = vcmp.gt.f32.partialorder %v2284_v24, %v1018_v48  ;;  %v1118_v14 = vadd.s32 32, %v1116_v9 }
 0x11c   : > { %1063 = vrot.lane.b32.xlu1 %v1016_v16, %s1987_s30  ;;  %1065 = vrot.lane.b32.xlu0 %v1001_v15, %s1989_s12  ;;  %s1993_s30 = smov 8   ;;  %v1899_v27 = vadd.f32 %v1767_v5, %v1739_v26  ;;  %v592_v30 = vpop.f32.mrb[5].mxu1  ;;  %v1119_v15 = vadd.s32 64, %v1116_v9  ;;  %v1120_v24 = vadd.s32 96, %v1116_v9  ;;  %v1123_v26 = vadd.s32 192, %v1116_v9 }
 0x11d   : > { %v1742_v31 = vpop.f32.mrb[6].mxu1  ;;  %v1903_v35 = vadd.f32 %v730_v20, %v592_v30  ;;  %v1020_v49 = vpop.permute.xlu1 %1019 }
 0x11e   : > { %v602_v34 = vpop.f32.mrb[7].mxu1  ;;  %vm1042_vm12 = vcmp.gt.f32.partialorder %v2291_v28, %v1020_v49 }
 0x11f   : > { %v1795_v38 = vpop.f32.mrb[8].mxu1 }
 0x120   : > { %1067 = vrot.lane.b32.xlu1 %v1002_v17, %s1989_s12  ;;  %1069 = vrot.lane.b32.xlu0 %v1003_v18, %s1989_s12  ;;  %v855_v40 = vpop.f32.mrb[9].mxu1 }
 0x121   : > { %v2453_v41 = vadd.f32 %v1903_v35, %v855_v40  ;;  %v1798_v44 = vpop.f32.mrb[10].mxu1  ;;  %v1124_v35 = vadd.s32 224, %v1116_v9 }
 0x124   : > { %1071 = vrot.lane.b32.xlu1 %v1004_v0, %s1989_s12  ;;  %1073 = vrot.lane.b32.xlu0 %v1005_v19, %s1989_s12 }
 0x128   : > { %1075 = vrot.lane.b32.xlu1 %v1006_v2, %s1989_s12  ;;  %1077 = vrot.lane.b32.xlu0 %v1007_v1, %s1989_s12  ;;  %v1121_v1 = vadd.s32 128, %v1116_v9 }
 0x12c   : > { %1079 = vrot.lane.b32.xlu1 %v1008_v3, %s1989_s12  ;;  %1273 = vrot.lane.b32.xlu0 %v2340_v39, %s1993_s30  ;;  %v2451_v39 = vadd.f32 %v1899_v27, %v1795_v38 }
 0x130   : > { %1275 = vrot.lane.b32.xlu1 %v2345_v42, %s1993_s30  ;;  %1277 = vrot.lane.b32.xlu0 %v2348_v43, %s1993_s30  ;;  %v1907_v42 = vadd.f32 %v1770_v22, %v1742_v31  ;;  %v1911_v43 = vadd.f32 %v740_v23, %v602_v34  ;;  %v1122_v23 = vadd.s32 160, %v1116_v9 }
 0x132   : > { %v2455_v45 = vadd.f32 %v1907_v42, %v1798_v44 }
 0x134   : > { %1279 = vrot.lane.b32.xlu1 %v2355_v46, %s1993_s30  ;;  %1281 = vrot.lane.b32.xlu0 %v2358_v47, %s1993_s30  ;;  %v865_v46 = vpop.f32.mrb[11].mxu1 }
 0x135   : > { %v2457_v47 = vadd.f32 %v1911_v43, %v865_v46  ;;  %v1602_v43 = vld [vmem:[%s2620_s3] ss:$0 sm:$0xff] }
 0x136   : > { %v1893_v48 = vadd.f32 %v1602_v43, %v2440_v6 }
 0x138   : > { %1283 = vrot.lane.b32.xlu1 %v2365_v50, %s1993_s30  ;;  %1285 = vrot.lane.b32.xlu0 %v2368_v51, %s1993_s30  ;;  %v1022_v50 = vpop.permute.xlu0 %1021  ;;  %v1024_v51 = vpop.permute.xlu1 %1023 }
 0x139   : > { %vm1043_vm13 = vcmp.gt.f32.partialorder %v2288_v25, %v1022_v50  ;;  %vm1044_vm14 = vcmp.gt.f32.partialorder %v2296_v29, %v1024_v51 }
 0x13c   : > { %1287 = vrot.lane.b32.xlu1 %v2375_v54, %s1993_s30  ;;  %v1026_v52 = vpop.permute.xlu0 %1025  ;;  %v1028_v53 = vpop.permute.xlu1 %1027 }
 0x13d   : > { %vm1045_vm15 = vcmp.gt.f32.partialorder %v2299_v32, %v1026_v52  ;;  %vm1046_vm1 = vcmp.gt.f32.partialorder %v2304_v33, %v1028_v53  ;;  %v1895_v53 = vadd.f32 %v2442_v21, %v1602_v43 }
 0x140   : > { %v1030_v54 = vpop.permute.xlu0 %1029  ;;  %v1032_v55 = vpop.permute.xlu1 %1031 }
 0x141   : > { %vm1047_vm2 = vcmp.gt.f32.partialorder %v2307_v36, %v1030_v54  ;;  %vm1048_vm3 = vcmp.gt.f32.partialorder %v2312_v37, %v1032_v55  ;;  %v1891_v37 = vadd.f32 %v2438_v4, %v1602_v43 }
 0x17e   : > { %v1050_v56 = vpop.permute.xlu0 %1049 }
 0x182   : > { %v1052_v57 = vpop.permute.xlu1 %1051  ;;  %v1054_v58 = vpop.permute.xlu0 %1053 }
 0x186   : > { %v1056_v60 = vpop.permute.xlu1 %1055  ;;  %v1058_v61 = vpop.permute.xlu0 %1057 }
 0x18a   : > { %v1060_v63 = vpop.permute.xlu1 %1059  ;;  %v1062_v8 = vpop.permute.xlu0 %1061 }
 0x18e   : > { %v1064_v10 = vpop.permute.xlu1 %1063  ;;  %v1066_v11 = vpop.permute.xlu0 %1065 }
 0x18f   : > { %v1081_v12 = vsel %vm1041_vm11, %v1050_v56, %v1066_v11  ;;  %v1901_v11 = vadd.f32 %v2451_v39, %v1602_v43 }
 0x190   : > { %v1125_v13 = vadd.s32 %v1116_v9, %v1081_v12 }
 0x192   : > { %v1068_v16 = vpop.permute.xlu1 %1067  ;;  %1359 = vrot.lane.b32.xlu0 %v1125_v13, %s1994_s14  ;;  %v1070_v17 = vpop.permute.xlu0 %1069 }
 0x193   : > { %v1082_v18 = vsel %vm1042_vm12, %v1052_v57, %v1068_v16  ;;  %v1083_v0 = vsel %vm1043_vm13, %v1054_v58, %v1070_v17  ;;  %v1897_v58 = vadd.f32 %v1602_v43, %v2444_v7 }
 0x194   : > { %v1126_v19 = vadd.s32 %v1118_v14, %v1082_v18  ;;  %v1127_v2 = vadd.s32 %v1119_v15, %v1083_v0  ;;  %v1905_v14 = vadd.f32 %v2453_v41, %v1602_v43  ;;  %v1909_v41 = vadd.f32 %v2455_v45, %v1602_v43 }
 0x196   : > { %1361 = vrot.lane.b32.xlu1 %v1126_v19, %s1994_s14  ;;  %v1072_v28 = vpop.permute.xlu1 %1071  ;;  %1363 = vrot.lane.b32.xlu0 %v1127_v2, %s1994_s14  ;;  %v1074_v25 = vpop.permute.xlu0 %1073 }
 0x197   : > { %v1084_v3 = vsel %vm1044_vm14, %v1056_v60, %v1072_v28  ;;  %v1085_v5 = vsel %vm1045_vm15, %v1058_v61, %v1074_v25 }
 0x198   : > { %v1128_v20 = vadd.s32 %v1120_v24, %v1084_v3  ;;  %v1129_v22 = vadd.s32 %v1121_v1, %v1085_v5  ;;  %v1913_v3 = vadd.f32 %v2457_v47, %v1602_v43 }
 0x19a   : > { %1365 = vrot.lane.b32.xlu1 %v1128_v20, %s1994_s14  ;;  %v1076_v29 = vpop.permute.xlu1 %1075  ;;  %1367 = vrot.lane.b32.xlu0 %v1129_v22, %s1994_s14  ;;  %v1078_v32 = vpop.permute.xlu0 %1077 }
 0x19b   : > { %v1086_v27 = vsel %vm1046_vm1, %v1060_v63, %v1076_v29  ;;  %v1087_v30 = vsel %vm1047_vm2, %v1062_v8, %v1078_v32 }
 0x19c   : > { %v1130_v31 = vadd.s32 %v1122_v23, %v1086_v27  ;;  %v1131_v34 = vadd.s32 %v1123_v26, %v1087_v30 }
 0x19e   : > { %1369 = vrot.lane.b32.xlu1 %v1130_v31, %s1994_s14  ;;  %v1080_v38 = vpop.permute.xlu1 %1079  ;;  %1371 = vrot.lane.b32.xlu0 %v1131_v34, %s1994_s14  ;;  %v1274_v40 = vpop.permute.xlu0 %1273 }
 0x19f   : > { %v1088_v33 = vsel %vm1048_vm3, %v1064_v10, %v1080_v38  ;;  %v1298_v50 = vsel %vm1297_vm4, 0.0, %v1274_v40 }
 0x1a0   : > { %v1132_v36 = vadd.s32 %v1124_v35, %v1088_v33  ;;  %v1307_v4 = vsel %vm1306_vm5, %v1298_v50, 0.0 }
 0x1a2   : > { %1373 = vrot.lane.b32.xlu1 %v1132_v36, %s1994_s14  ;;  %v1276_v42 = vpop.permute.xlu1 %1275  ;;  %v1278_v44 = vpop.permute.xlu0 %1277 }
 0x1a3   : > { %v1299_v49 = vsel %vm1297_vm4, 0.0, %v1276_v42  ;;  %v1300_v61 = vsel %vm1297_vm4, 0.0, %v1278_v44 }
 0x1a4   : > { %v1308_v56 = vsel %vm1306_vm5, %v1299_v49, 0.0  ;;  %v1309_v15 = vsel %vm1306_vm5, %v1300_v61, 0.0 }
 0x1a6   : > { %v1280_v46 = vpop.permute.xlu1 %1279  ;;  %v1282_v52 = vpop.permute.xlu0 %1281 }
 0x1a7   : > { %v1301_v62 = vsel %vm1297_vm4, 0.0, %v1280_v46  ;;  %v1302_v0 = vsel %vm1297_vm4, 0.0, %v1282_v52 }
 0x1a8   : > { %v1310_v16 = vsel %vm1306_vm5, %v1301_v62, 0.0  ;;  %v1311_v26 = vsel %vm1306_vm5, %v1302_v0, 0.0 }
 0x1aa   : > { %v1284_v57 = vpop.permute.xlu1 %1283  ;;  %v1286_v18 = vpop.permute.xlu0 %1285 }
 0x1ab   : > { %v1303_v17 = vsel %vm1297_vm4, 0.0, %v1284_v57  ;;  %v1304_v29 = vsel %vm1297_vm4, 0.0, %v1286_v18 }
 0x1ac   : > { %v1312_v5 = vsel %vm1306_vm5, %v1303_v17, 0.0  ;;  %v1313_v43 = vsel %vm1306_vm5, %v1304_v29, 0.0 }
 0x1ae   : > { %v1288_v19 = vpop.permute.xlu1 %1287 }
 0x1af   : > { %v1305_v32 = vsel %vm1297_vm4, 0.0, %v1288_v19 }
 0x1b0   : > { %v1314_v44 = vsel %vm1306_vm5, %v1305_v32, 0.0 }
 0x1d3   : > { %v1805_v51 = vpop.f32.mrb[0].mxu0 }
 0x1d4   : > { %v1892_v54 = vadd.f32 %v1891_v37, %v1805_v51  ;;  %v1226_v55 = vpop.f32.mrb[1].mxu0 }
 0x1d5   : > { %v1894_v60 = vadd.f32 %v1893_v48, %v1226_v55 }
 0x1d6   : > { %v2487_v6 = vadd.f32 %v1892_v54, %v1308_v56 }
 0x1d7   : > { %v2491_v63 = vadd.f32 %v1894_v60, %v1307_v4  ;;  %v1808_v8 = vpop.f32.mrb[2].mxu0 }
 0x1d8   : > { %v1337_v21 = vmul.f32 %v2487_v6, %v2487_v6  ;;  %v1896_v9 = vadd.f32 %v1895_v53, %v1808_v8  ;;  %v1236_v10 = vpop.f32.mrb[3].mxu0 }
 0x1d9   : > { %v1323_v7 = vadd.f32 %v2487_v6, %v2491_v63  ;;  %v1336_v12 = vmul.f32 %v2491_v63, %v2491_v63  ;;  %v1898_v13 = vadd.f32 %v1897_v58, %v1236_v10 }
 0x1da   : > { %v2505_v2 = vadd.f32 %v1896_v9, %v1310_v16 }
 0x1db   : > { %v1344_v39 = vadd.f32 %v1337_v21, %v1336_v12  ;;  %v2507_v24 = vadd.f32 %v1898_v13, %v1309_v15  ;;  %v1811_v1 = vpop.f32.mrb[8].mxu0 }
 0x1dc   : > { %v1902_v28 = vadd.f32 %v1901_v11, %v1811_v1  ;;  %v1246_v25 = vpop.f32.mrb[9].mxu0  ;;  %v1339_v45 = vmul.f32 %v2505_v2, %v2505_v2 }
 0x1dd   : > { %v1324_v20 = vadd.f32 %v1323_v7, %v2507_v24  ;;  %v1338_v22 = vmul.f32 %v2507_v24, %v2507_v24  ;;  %v1906_v23 = vadd.f32 %v1905_v14, %v1246_v25  ;;  %v1401_v14 = vand.u32 127, %v1098_v59 }
 0x1de   : > { %v2518_v27 = vadd.f32 %v1902_v28, %v1312_v5 }
 0x1df   : > { %v1345_v47 = vadd.f32 %v1344_v39, %v1338_v22  ;;  %v2522_v30 = vadd.f32 %v1906_v23, %v1311_v26  ;;  %v1325_v31 = vadd.f32 %v1324_v20, %v2505_v2  ;;  %v1814_v34 = vpop.f32.mrb[10].mxu0  ;;  %vm1402_vm6 = vcmp.ge.s32.totalorder %v1401_v14, 24 }
 0x1e0   : > { %v1910_v35 = vadd.f32 %v1909_v41, %v1814_v34  ;;  %v1256_v38 = vpop.f32.mrb[11].mxu0  ;;  %v1341_v46 = vmul.f32 %v2518_v27, %v2518_v27  ;;  %vm1403_vm7 = vcmp.lt.s32.totalorder %v1401_v14, 40 }
 0x1e1   : > { %v1326_v33 = vadd.f32 %v1325_v31, %v2522_v30  ;;  %v1340_v36 = vmul.f32 %v2522_v30, %v2522_v30  ;;  %v1346_v40 = vadd.f32 %v1345_v47, %v1339_v45  ;;  %v1914_v42 = vadd.f32 %v1913_v3, %v1256_v38  ;;  %vm2549_vm9 = vmand %vm1402_vm6, %vm1403_vm7 }
 0x1e2   : > { %v2532_v48 = vadd.f32 %v1910_v35, %v1314_v44 }
 0x1e3   : > { %v1347_v37 = vadd.f32 %v1346_v40, %v1340_v36  ;;  %v2534_v49 = vadd.f32 %v1914_v42, %v1313_v43  ;;  %v1327_v50 = vadd.f32 %v1326_v33, %v2518_v27 }
 0x1e4   : > { %v1343_v54 = vmul.f32 %v2532_v48, %v2532_v48 }
 0x1e5   : > { %v1328_v51 = vadd.f32 %v1327_v50, %v2534_v49  ;;  %v1342_v52 = vmul.f32 %v2534_v49, %v2534_v49  ;;  %v1348_v53 = vadd.f32 %v1347_v37, %v1341_v46 }
 0x1e7   : > { %v1329_v55 = vadd.f32 %v1328_v51, %v2532_v48  ;;  %v1349_v56 = vadd.f32 %v1348_v53, %v1342_v52 }
 0x1e9   : > { %v1330_v57 = vrot.slane %v1329_v55, 4  ;;  %v1350_v58 = vadd.f32 %v1349_v56, %v1343_v54 }
 0x1eb   : > { %v1331_v60 = vadd.f32 %v1330_v57, %v1329_v55  ;;  %v1351_v4 = vrot.slane %v1350_v58, 4 }
 0x1ed   : > { %v1332_v61 = vrot.slane %v1331_v60, 2  ;;  %v1352_v62 = vadd.f32 %v1351_v4, %v1350_v58 }
 0x1ef   : > { %v1333_v8 = vadd.f32 %v1332_v61, %v1331_v60  ;;  %v1353_v21 = vrot.slane %v1352_v62, 2 }
 0x1f1   : > { %v1334_v9 = vrot.slane %v1333_v8, 1  ;;  %v1354_v10 = vadd.f32 %v1353_v21, %v1352_v62 }
 0x1f3   : > { %v1355_v11 = vrot.slane %v1354_v10, 1  ;;  %v1335_v7 = vadd.f32 %v1334_v9, %v1333_v8 }
 0x1f5   : > { %v1356_v12 = vadd.f32 %v1355_v11, %v1354_v10 }
 0x1f7   : > { %v1357_v13 = vsel %vm352_vm0, %v1335_v7, %v1356_v12 }
 0x1f8   : > { %1358 = vst [vmem:[%s317_s20] sm:$0x3] %v1357_v13 }
 0x204   : > { %v1360_v16 = vpop.permute.xlu0 %1359 }
 0x205   : > { %v1375_v17 = vsel %vm1306_vm5, 0, %v1360_v16 }
 0x206   : > { %v1384_v59 = vsel %vm1383_vm8, %v1375_v17, 0 }
 0x207   : > { %v1405_v18 = vsel %vm2549_vm9, %v1384_v59, %v2491_v63 }
 0x208   : > { %1413 = vst [vmem:[%s2558_s28] sm:$0xff] %v1405_v18  ;;  %v1362_v0 = vpop.permute.xlu1 %1361  ;;  %v1364_v19 = vpop.permute.xlu0 %1363 }
 0x209   : > { %v1376_v39 = vsel %vm1306_vm5, 0, %v1362_v0  ;;  %v1377_v1 = vsel %vm1306_vm5, 0, %v1364_v19 }
 0x20a   : > { %v1385_v28 = vsel %vm1383_vm8, %v1376_v39, 0  ;;  %v1386_v25 = vsel %vm1383_vm8, %v1377_v1, 0 }
 0x20b   : > { %v1406_v41 = vsel %vm2549_vm9, %v1385_v28, %v2487_v6  ;;  %v1407_v63 = vsel %vm2549_vm9, %v1386_v25, %v2507_v24 }
 0x20c   : > { %1414 = vst [vmem:[%s2558_s28 + $0x8] sm:$0xff] %v1406_v41  ;;  %1415 = vst [vmem:[%s2558_s28 + $0x10] sm:$0xff] %v1407_v63  ;;  %v1366_v3 = vpop.permute.xlu1 %1365  ;;  %v1368_v5 = vpop.permute.xlu0 %1367 }
 0x20d   : > { %v1378_v20 = vsel %vm1306_vm5, 0, %v1366_v3  ;;  %v1379_v22 = vsel %vm1306_vm5, 0, %v1368_v5 }
 0x20e   : > { %v1387_v23 = vsel %vm1383_vm8, %v1378_v20, 0  ;;  %v1388_v26 = vsel %vm1383_vm8, %v1379_v22, 0 }
 0x20f   : > { %v1408_v6 = vsel %vm2549_vm9, %v1387_v23, %v2505_v2  ;;  %v1409_v24 = vsel %vm2549_vm9, %v1388_v26, %v2522_v30 }
 0x210   : > { %1416 = vst [vmem:[%s2558_s28 + $0x18] sm:$0xff] %v1408_v6  ;;  %1417 = vst [vmem:[%s2558_s28 + $0x20] sm:$0xff] %v1409_v24  ;;  %v1370_v29 = vpop.permute.xlu1 %1369  ;;  %v1372_v32 = vpop.permute.xlu0 %1371 }
 0x211   : > { %v1380_v45 = vsel %vm1306_vm5, 0, %v1370_v29  ;;  %v1381_v47 = vsel %vm1306_vm5, 0, %v1372_v32 }
 0x212   : > { %v1389_v31 = vsel %vm1383_vm8, %v1380_v45, 0  ;;  %v1390_v34 = vsel %vm1383_vm8, %v1381_v47, 0 }
 0x213   : > { %v1410_v2 = vsel %vm2549_vm9, %v1389_v31, %v2518_v27  ;;  %v1411_v30 = vsel %vm2549_vm9, %v1390_v34, %v2534_v49 }
 0x214   : > { %1418 = vst [vmem:[%s2558_s28 + $0x28] sm:$0xff] %v1410_v2  ;;  %1419 = vst [vmem:[%s2558_s28 + $0x30] sm:$0xff] %v1411_v30  ;;  %v1374_v35 = vpop.permute.xlu1 %1373 }
 0x215   : > { %v1382_v38 = vsel %vm1306_vm5, 0, %v1374_v35 }
 0x216   : > { %v1391_v33 = vsel %vm1383_vm8, %v1382_v38, 0 }
 0x217   : > { %v1412_v36 = vsel %vm2549_vm9, %v1391_v33, %v2532_v48 }
 0x218   : > { %1420 = vst [vmem:[%s2558_s28 + $0x38] sm:$0xff] %v1412_v36 }
 0x219 PF: > { %s17_s23 = sadd.s32 1, %s1985_s23   ;;  %s2626_s21 = smov %s1981_s22 }
 0x21a   : > { %p14_p6 = scmp.ge.s32.totalorder %s17_s23, 4   ;;  %s2627_s22 = smov %s2629_s24 }
 0x21c   :  { %16 = sbr.rel (!%p14_p6) target bundleno = 2 (0x2), region = 88 }

</bundles_post_ra>
